<compile_context>
chip_gen: v5e
topology: v5e:2x2
jax: 0.10.0
libtpu: 0.0.40
codegen_flags: <defaults>
</compile_context>

<pallas_src>
import jax
import jax.numpy as jnp
from jax.experimental import pallas as pl
from jax.experimental.pallas import tpu as pltpu

LANE = 128


def _round_up(v, m=LANE):
    return ((v + m - 1) // m) * m


# ----------------------------------------------------------------------------
# Fused kernel: conv(3x3, pad=1) + bias + ReLU + global-avg-pool + MLP head
# One grid step == one image.
# ----------------------------------------------------------------------------
def fused_simclr_kernel(xp_ref, wct_ref, bc_ref, w1_ref, b1_ref, w2_ref, b2_ref,
                        y_ref, acc_ref):
    # xp_ref : (1, H+2, W+2, C) f32   one spatially padded NHWC image
    # wct_ref: (9, C, Fp)       bf16  conv taps, t = kh*3 + kw
    # bc_ref : (1, Fp)          f32   conv bias (zero-padded)
    # w1_ref : (Fp, Hp)  bf16 ; b1_ref: (1, Hp)  f32   projector Linear
    # w2_ref : (Hp, NCp) bf16 ; b2_ref: (1, NCp) f32   finetune Linear
    # y_ref  : (1, 1, NCp)      f32   logits (lane-dense, padded)
    # acc_ref: (P, Fp)          f32   VMEM accumulator for pre-pool activation
    H = xp_ref.shape[1] - 2
    W = xp_ref.shape[2] - 2
    C = xp_ref.shape[3]
    P = H * W

    acc_ref[...] = jnp.zeros_like(acc_ref)

    # Conv2d as 9 accumulated 2-D MXU matmuls over shifted views of the padded
    # image already resident in VMEM (no 9x im2col replication in HBM).
    for t in range(9):
        kh, kw = t // 3, t % 3
        tap = xp_ref[0, kh:kh + H, kw:kw + W, :]              # (H, W, C) f32
        tap = tap.reshape(P, C).astype(jnp.bfloat16)          # (P, C)    bf16
        acc_ref[...] += jnp.dot(tap, wct_ref[t],
                                preferred_element_type=jnp.float32)

    # Bias broadcast once + ReLU in f32, then global average pool (sum * 1/P).
    act = jnp.maximum(acc_ref[...] + bc_ref[...], 0.0)        # (P, Fp)
    h = jnp.sum(act, axis=0, keepdims=True) * (1.0 / P)       # (1, Fp)

    # Projector (Linear + ReLU) fused with the finetune Linear head.
    hp = jnp.dot(h.astype(jnp.bfloat16), w1_ref[...],
                 preferred_element_type=jnp.float32) + b1_ref[...]
    hp = jnp.maximum(hp, 0.0)
    y = jnp.dot(hp.astype(jnp.bfloat16), w2_ref[...],
                preferred_element_type=jnp.float32) + b2_ref[...]
    y_ref[0] = y


# ----------------------------------------------------------------------------
# Wrapper: layout plumbing (NHWC pad, tap-major weights, 128-lane padding)
# ----------------------------------------------------------------------------
def simclr_ft_forward(x, params):
    B, C, H, W = x.shape
    wc, bc = params["conv_w"], params["conv_b"]            # (F, C, 3, 3), (F,)
    w1, b1 = params["proj_w"], params["proj_b"]            # (F, Hd), (Hd,)
    w2, b2 = params["lin_w"], params["lin_b"]              # (Hd, NC), (NC,)
    F, Hd, NC = wc.shape[0], w1.shape[1], w2.shape[1]
    Fp, Hp, NCp = _round_up(F), _round_up(Hd), _round_up(NC)
    P = H * W

    # NHWC, spatially padded once (stride-1, pad-1, 3x3 conv).
    xp = jnp.pad(x.transpose(0, 2, 3, 1), ((0, 0), (1, 1), (1, 1), (0, 0)))

    # Conv taps: wct[t, c, f] = wc[f, c, kh, kw] with t = kh*3 + kw.
    wct = wc.transpose(2, 3, 1, 0).reshape(9, C, F)
    wct = jnp.pad(wct, ((0, 0), (0, 0), (0, Fp - F))).astype(jnp.bfloat16)
    bcp = jnp.pad(bc, (0, Fp - F)).reshape(1, Fp).astype(jnp.float32)

    w1p = jnp.pad(w1, ((0, Fp - F), (0, Hp - Hd))).astype(jnp.bfloat16)
    b1p = jnp.pad(b1, (0, Hp - Hd)).reshape(1, Hp).astype(jnp.float32)
    w2p = jnp.pad(w2, ((0, Hp - Hd), (0, NCp - NC))).astype(jnp.bfloat16)
    b2p = jnp.pad(b2, (0, NCp - NC)).reshape(1, NCp).astype(jnp.float32)

    y_pad = pl.pallas_call(
        fused_simclr_kernel,
        out_shape=jax.ShapeDtypeStruct((B, 1, NCp), jnp.float32),
        grid_spec=pltpu.PrefetchScalarGridSpec(
            num_scalar_prefetch=0,
            grid=(B,),
            in_specs=[
                pl.BlockSpec((1, H + 2, W + 2, C), lambda b: (b, 0, 0, 0)),
                pl.BlockSpec((9, C, Fp), lambda b: (0, 0, 0)),
                pl.BlockSpec((1, Fp), lambda b: (0, 0)),
                pl.BlockSpec((Fp, Hp), lambda b: (0, 0)),
                pl.BlockSpec((1, Hp), lambda b: (0, 0)),
                pl.BlockSpec((Hp, NCp), lambda b: (0, 0)),
                pl.BlockSpec((1, NCp), lambda b: (0, 0)),
            ],
            out_specs=pl.BlockSpec((1, 1, NCp), lambda b: (b, 0, 0)),
            scratch_shapes=[pltpu.VMEM((P, Fp), jnp.float32)],
        ),
        compiler_params=pltpu.CompilerParams(
            dimension_semantics=("parallel",),
            vmem_limit_bytes=32 * 1024 * 1024,
        ),
    )(xp, wct, bcp, w1p, b1p, w2p, b2p)

    return y_pad.reshape(B, NCp)[:, :NC]


# ----------------------------------------------------------------------------
# Pure-JAX f32 reference (for numerical validation of the bf16-operand kernel)
# ----------------------------------------------------------------------------
def reference_forward(x, params):
    y = jax.lax.conv_general_dilated(
        x, params["conv_w"], window_strides=(1, 1), padding="SAME",
        dimension_numbers=("NCHW", "OIHW", "NCHW"))
    y = jnp.maximum(y + params["conv_b"][None, :, None, None], 0.0)
    h = jnp.mean(y, axis=(2, 3))
    hp = jnp.maximum(h @ params["proj_w"] + params["proj_b"], 0.0)
    return hp @ params["lin_w"] + params["lin_b"]


def init_params(key, c_in=4, feat=32, hidden=64, n_classes=10):
    ks = jax.random.split(key, 6)
    scale = 0.05
    return {
        "conv_w": scale * jax.random.normal(ks[0], (feat, c_in, 3, 3), jnp.float32),
        "conv_b": scale * jax.random.normal(ks[1], (feat,), jnp.float32),
        "proj_w": scale * jax.random.normal(ks[2], (feat, hidden), jnp.float32),
        "proj_b": scale * jax.random.normal(ks[3], (hidden,), jnp.float32),
        "lin_w": scale * jax.random.normal(ks[4], (hidden, n_classes), jnp.float32),
        "lin_b": scale * jax.random.normal(ks[5], (n_classes,), jnp.float32),
    }


if __name__ == "__main__":
    key = jax.random.PRNGKey(0)
    k_x, k_p = jax.random.split(key)
    B, C, H, W = 2, 4, 16, 16
    x = jax.random.normal(k_x, (B, C, H, W), jnp.float32)
    params = init_params(k_p, c_in=C, feat=32, hidden=64, n_classes=10)

    y = jax.jit(simclr_ft_forward)(x, params)
    jax.block_until_ready(y)

    assert y.shape == (B, 10) and y.dtype == jnp.float32
    y_ref = reference_forward(x, params)
    assert jnp.allclose(y, y_ref, rtol=5e-2, atol=1e-2), (
        "max abs err", float(jnp.max(jnp.abs(y - y_ref))))
    print("KERNEL_OK")
</pallas_src>

<mosaic_0001>
module attributes {stable_mosaic.version = 11 : i64} {
  func.func @fused_simclr_kernel(%arg0: i32, %arg1: memref<1x18x18x4xf32, #tpu.memory_space<vmem>>, %arg2: memref<9x4x128xbf16, #tpu.memory_space<vmem>>, %arg3: memref<1x128xf32, #tpu.memory_space<vmem>>, %arg4: memref<128x128xbf16, #tpu.memory_space<vmem>>, %arg5: memref<1x128xf32, #tpu.memory_space<vmem>>, %arg6: memref<128x128xbf16, #tpu.memory_space<vmem>>, %arg7: memref<1x128xf32, #tpu.memory_space<vmem>>, %arg8: memref<1x1x128xf32, #tpu.memory_space<vmem>>, %arg9: memref<256x128xf32, #tpu.memory_space<vmem>>) attributes {dimension_semantics = [#tpu.dimension_semantics<parallel>], iteration_bounds = array<i64: 2>, scalar_prefetch = 0 : i64, scratch_operands = 1 : i64, tpu.core_type = #tpu.core_type<tc>, window_params = [{transform_indices = @transform_0, window_bounds = array<i64: 1, 18, 18, 4>}, {pipeline_mode = #tpu.pipeline_mode<synchronous>, transform_indices = @transform_1, window_bounds = array<i64: 9, 4, 128>}, {pipeline_mode = #tpu.pipeline_mode<synchronous>, transform_indices = @transform_2, window_bounds = array<i64: 1, 128>}, {pipeline_mode = #tpu.pipeline_mode<synchronous>, transform_indices = @transform_3, window_bounds = array<i64: 128, 128>}, {pipeline_mode = #tpu.pipeline_mode<synchronous>, transform_indices = @transform_4, window_bounds = array<i64: 1, 128>}, {pipeline_mode = #tpu.pipeline_mode<synchronous>, transform_indices = @transform_5, window_bounds = array<i64: 128, 128>}, {pipeline_mode = #tpu.pipeline_mode<synchronous>, transform_indices = @transform_6, window_bounds = array<i64: 1, 128>}, {transform_indices = @transform_7, window_bounds = array<i64: 1, 1, 128>}]} {
    %cst = arith.constant 0.000000e+00 : f32
    %0 = vector.broadcast %cst : f32 to vector<256x128xf32>
    %c0 = arith.constant 0 : index
    %c0_0 = arith.constant 0 : index
    %1 = vector.load %arg9[%c0, %c0_0] : memref<256x128xf32, #tpu.memory_space<vmem>>, vector<256x128xf32>
    tpu.vector_store %arg9[%c0, %c0_0], %0 {strides = array<i32>} : memref<256x128xf32, #tpu.memory_space<vmem>>, vector<256x128xf32>,
    %c0_1 = arith.constant 0 : index
    %c0_2 = arith.constant 0 : index
    %c0_3 = arith.constant 0 : index
    %c0_4 = arith.constant 0 : index
    %2 = vector.load %arg1[%c0_1, %c0_2, %c0_3, %c0_4] : memref<1x18x18x4xf32, #tpu.memory_space<vmem>>, vector<1x16x16x4xf32>
    %3 = vector.shape_cast %2 : vector<1x16x16x4xf32> to vector<16x16x4xf32>
    %4 = vector.shape_cast %3 : vector<16x16x4xf32> to vector<256x4xf32>
    %5 = arith.truncf %4 : vector<256x4xf32> to vector<256x4xbf16>
    %c0_5 = arith.constant 0 : index
    %c0_6 = arith.constant 0 : index
    %6 = vector.load %arg9[%c0_5, %c0_6] : memref<256x128xf32, #tpu.memory_space<vmem>>, vector<256x128xf32>
    %c0_7 = arith.constant 0 : index
    %c0_8 = arith.constant 0 : index
    %c0_9 = arith.constant 0 : index
    %7 = vector.load %arg2[%c0_7, %c0_8, %c0_9] : memref<9x4x128xbf16, #tpu.memory_space<vmem>>, vector<1x4x128xbf16>
    %8 = vector.shape_cast %7 : vector<1x4x128xbf16> to vector<4x128xbf16>
    %cst_10 = arith.constant dense<0.000000e+00> : vector<256x128xf32>
    %9 = tpu.matmul %5, %8, %cst_10 {dimension_numbers = #tpu.dot_dimension_numbers<[1], [0], [0], [1], [0, 0, 1, 1], [], []>} : vector<256x4xbf16>, vector<4x128xbf16>, vector<256x128xf32> -> vector<256x128xf32>
    %10 = arith.addf %6, %9 : vector<256x128xf32>
    %c0_11 = arith.constant 0 : index
    %c0_12 = arith.constant 0 : index
    %11 = vector.load %arg9[%c0_11, %c0_12] : memref<256x128xf32, #tpu.memory_space<vmem>>, vector<256x128xf32>
    tpu.vector_store %arg9[%c0_11, %c0_12], %10 {strides = array<i32>} : memref<256x128xf32, #tpu.memory_space<vmem>>, vector<256x128xf32>,
    %c0_13 = arith.constant 0 : index
    %c0_14 = arith.constant 0 : index
    %c1 = arith.constant 1 : index
    %c0_15 = arith.constant 0 : index
    %12 = vector.load %arg1[%c0_13, %c0_14, %c1, %c0_15] : memref<1x18x18x4xf32, #tpu.memory_space<vmem>>, vector<1x16x16x4xf32>
    %13 = vector.shape_cast %12 : vector<1x16x16x4xf32> to vector<16x16x4xf32>
    %14 = vector.shape_cast %13 : vector<16x16x4xf32> to vector<256x4xf32>
    %15 = arith.truncf %14 : vector<256x4xf32> to vector<256x4xbf16>
    %c0_16 = arith.constant 0 : index
    %c0_17 = arith.constant 0 : index
    %16 = vector.load %arg9[%c0_16, %c0_17] : memref<256x128xf32, #tpu.memory_space<vmem>>, vector<256x128xf32>
    %c1_18 = arith.constant 1 : index
    %c0_19 = arith.constant 0 : index
    %c0_20 = arith.constant 0 : index
    %17 = vector.load %arg2[%c1_18, %c0_19, %c0_20] : memref<9x4x128xbf16, #tpu.memory_space<vmem>>, vector<1x4x128xbf16>
    %18 = vector.shape_cast %17 : vector<1x4x128xbf16> to vector<4x128xbf16>
    %cst_21 = arith.constant dense<0.000000e+00> : vector<256x128xf32>
    %19 = tpu.matmul %15, %18, %cst_21 {dimension_numbers = #tpu.dot_dimension_numbers<[1], [0], [0], [1], [0, 0, 1, 1], [], []>} : vector<256x4xbf16>, vector<4x128xbf16>, vector<256x128xf32> -> vector<256x128xf32>
    %20 = arith.addf %16, %19 : vector<256x128xf32>
    %c0_22 = arith.constant 0 : index
    %c0_23 = arith.constant 0 : index
    %21 = vector.load %arg9[%c0_22, %c0_23] : memref<256x128xf32, #tpu.memory_space<vmem>>, vector<256x128xf32>
    tpu.vector_store %arg9[%c0_22, %c0_23], %20 {strides = array<i32>} : memref<256x128xf32, #tpu.memory_space<vmem>>, vector<256x128xf32>,
    %c0_24 = arith.constant 0 : index
    %c0_25 = arith.constant 0 : index
    %c2 = arith.constant 2 : index
    %c0_26 = arith.constant 0 : index
    %22 = vector.load %arg1[%c0_24, %c0_25, %c2, %c0_26] : memref<1x18x18x4xf32, #tpu.memory_space<vmem>>, vector<1x16x16x4xf32>
    %23 = vector.shape_cast %22 : vector<1x16x16x4xf32> to vector<16x16x4xf32>
    %24 = vector.shape_cast %23 : vector<16x16x4xf32> to vector<256x4xf32>
    %25 = arith.truncf %24 : vector<256x4xf32> to vector<256x4xbf16>
    %c0_27 = arith.constant 0 : index
    %c0_28 = arith.constant 0 : index
    %26 = vector.load %arg9[%c0_27, %c0_28] : memref<256x128xf32, #tpu.memory_space<vmem>>, vector<256x128xf32>
    %c2_29 = arith.constant 2 : index
    %c0_30 = arith.constant 0 : index
    %c0_31 = arith.constant 0 : index
    %27 = vector.load %arg2[%c2_29, %c0_30, %c0_31] : memref<9x4x128xbf16, #tpu.memory_space<vmem>>, vector<1x4x128xbf16>
    %28 = vector.shape_cast %27 : vector<1x4x128xbf16> to vector<4x128xbf16>
    %cst_32 = arith.constant dense<0.000000e+00> : vector<256x128xf32>
    %29 = tpu.matmul %25, %28, %cst_32 {dimension_numbers = #tpu.dot_dimension_numbers<[1], [0], [0], [1], [0, 0, 1, 1], [], []>} : vector<256x4xbf16>, vector<4x128xbf16>, vector<256x128xf32> -> vector<256x128xf32>
    %30 = arith.addf %26, %29 : vector<256x128xf32>
    %c0_33 = arith.constant 0 : index
    %c0_34 = arith.constant 0 : index
    %31 = vector.load %arg9[%c0_33, %c0_34] : memref<256x128xf32, #tpu.memory_space<vmem>>, vector<256x128xf32>
    tpu.vector_store %arg9[%c0_33, %c0_34], %30 {strides = array<i32>} : memref<256x128xf32, #tpu.memory_space<vmem>>, vector<256x128xf32>,
    %c0_35 = arith.constant 0 : index
    %c1_36 = arith.constant 1 : index
    %c0_37 = arith.constant 0 : index
    %c0_38 = arith.constant 0 : index
    %32 = vector.load %arg1[%c0_35, %c1_36, %c0_37, %c0_38] : memref<1x18x18x4xf32, #tpu.memory_space<vmem>>, vector<1x16x16x4xf32>
    %33 = vector.shape_cast %32 : vector<1x16x16x4xf32> to vector<16x16x4xf32>
    %34 = vector.shape_cast %33 : vector<16x16x4xf32> to vector<256x4xf32>
    %35 = arith.truncf %34 : vector<256x4xf32> to vector<256x4xbf16>
    %c0_39 = arith.constant 0 : index
    %c0_40 = arith.constant 0 : index
    %36 = vector.load %arg9[%c0_39, %c0_40] : memref<256x128xf32, #tpu.memory_space<vmem>>, vector<256x128xf32>
    %c3 = arith.constant 3 : index
    %c0_41 = arith.constant 0 : index
    %c0_42 = arith.constant 0 : index
    %37 = vector.load %arg2[%c3, %c0_41, %c0_42] : memref<9x4x128xbf16, #tpu.memory_space<vmem>>, vector<1x4x128xbf16>
    %38 = vector.shape_cast %37 : vector<1x4x128xbf16> to vector<4x128xbf16>
    %cst_43 = arith.constant dense<0.000000e+00> : vector<256x128xf32>
    %39 = tpu.matmul %35, %38, %cst_43 {dimension_numbers = #tpu.dot_dimension_numbers<[1], [0], [0], [1], [0, 0, 1, 1], [], []>} : vector<256x4xbf16>, vector<4x128xbf16>, vector<256x128xf32> -> vector<256x128xf32>
    %40 = arith.addf %36, %39 : vector<256x128xf32>
    %c0_44 = arith.constant 0 : index
    %c0_45 = arith.constant 0 : index
    %41 = vector.load %arg9[%c0_44, %c0_45] : memref<256x128xf32, #tpu.memory_space<vmem>>, vector<256x128xf32>
    tpu.vector_store %arg9[%c0_44, %c0_45], %40 {strides = array<i32>} : memref<256x128xf32, #tpu.memory_space<vmem>>, vector<256x128xf32>,
    %c0_46 = arith.constant 0 : index
    %c1_47 = arith.constant 1 : index
    %c1_48 = arith.constant 1 : index
    %c0_49 = arith.constant 0 : index
    %42 = vector.load %arg1[%c0_46, %c1_47, %c1_48, %c0_49] : memref<1x18x18x4xf32, #tpu.memory_space<vmem>>, vector<1x16x16x4xf32>
    %43 = vector.shape_cast %42 : vector<1x16x16x4xf32> to vector<16x16x4xf32>
    %44 = vector.shape_cast %43 : vector<16x16x4xf32> to vector<256x4xf32>
    %45 = arith.truncf %44 : vector<256x4xf32> to vector<256x4xbf16>
    %c0_50 = arith.constant 0 : index
    %c0_51 = arith.constant 0 : index
    %46 = vector.load %arg9[%c0_50, %c0_51] : memref<256x128xf32, #tpu.memory_space<vmem>>, vector<256x128xf32>
    %c4 = arith.constant 4 : index
    %c0_52 = arith.constant 0 : index
    %c0_53 = arith.constant 0 : index
    %47 = vector.load %arg2[%c4, %c0_52, %c0_53] : memref<9x4x128xbf16, #tpu.memory_space<vmem>>, vector<1x4x128xbf16>
    %48 = vector.shape_cast %47 : vector<1x4x128xbf16> to vector<4x128xbf16>
    %cst_54 = arith.constant dense<0.000000e+00> : vector<256x128xf32>
    %49 = tpu.matmul %45, %48, %cst_54 {dimension_numbers = #tpu.dot_dimension_numbers<[1], [0], [0], [1], [0, 0, 1, 1], [], []>} : vector<256x4xbf16>, vector<4x128xbf16>, vector<256x128xf32> -> vector<256x128xf32>
    %50 = arith.addf %46, %49 : vector<256x128xf32>
    %c0_55 = arith.constant 0 : index
    %c0_56 = arith.constant 0 : index
    %51 = vector.load %arg9[%c0_55, %c0_56] : memref<256x128xf32, #tpu.memory_space<vmem>>, vector<256x128xf32>
    tpu.vector_store %arg9[%c0_55, %c0_56], %50 {strides = array<i32>} : memref<256x128xf32, #tpu.memory_space<vmem>>, vector<256x128xf32>,
    %c0_57 = arith.constant 0 : index
    %c1_58 = arith.constant 1 : index
    %c2_59 = arith.constant 2 : index
    %c0_60 = arith.constant 0 : index
    %52 = vector.load %arg1[%c0_57, %c1_58, %c2_59, %c0_60] : memref<1x18x18x4xf32, #tpu.memory_space<vmem>>, vector<1x16x16x4xf32>
    %53 = vector.shape_cast %52 : vector<1x16x16x4xf32> to vector<16x16x4xf32>
    %54 = vector.shape_cast %53 : vector<16x16x4xf32> to vector<256x4xf32>
    %55 = arith.truncf %54 : vector<256x4xf32> to vector<256x4xbf16>
    %c0_61 = arith.constant 0 : index
    %c0_62 = arith.constant 0 : index
    %56 = vector.load %arg9[%c0_61, %c0_62] : memref<256x128xf32, #tpu.memory_space<vmem>>, vector<256x128xf32>
    %c5 = arith.constant 5 : index
    %c0_63 = arith.constant 0 : index
    %c0_64 = arith.constant 0 : index
    %57 = vector.load %arg2[%c5, %c0_63, %c0_64] : memref<9x4x128xbf16, #tpu.memory_space<vmem>>, vector<1x4x128xbf16>
    %58 = vector.shape_cast %57 : vector<1x4x128xbf16> to vector<4x128xbf16>
    %cst_65 = arith.constant dense<0.000000e+00> : vector<256x128xf32>
    %59 = tpu.matmul %55, %58, %cst_65 {dimension_numbers = #tpu.dot_dimension_numbers<[1], [0], [0], [1], [0, 0, 1, 1], [], []>} : vector<256x4xbf16>, vector<4x128xbf16>, vector<256x128xf32> -> vector<256x128xf32>
    %60 = arith.addf %56, %59 : vector<256x128xf32>
    %c0_66 = arith.constant 0 : index
    %c0_67 = arith.constant 0 : index
    %61 = vector.load %arg9[%c0_66, %c0_67] : memref<256x128xf32, #tpu.memory_space<vmem>>, vector<256x128xf32>
    tpu.vector_store %arg9[%c0_66, %c0_67], %60 {strides = array<i32>} : memref<256x128xf32, #tpu.memory_space<vmem>>, vector<256x128xf32>,
    %c0_68 = arith.constant 0 : index
    %c2_69 = arith.constant 2 : index
    %c0_70 = arith.constant 0 : index
    %c0_71 = arith.constant 0 : index
    %62 = vector.load %arg1[%c0_68, %c2_69, %c0_70, %c0_71] : memref<1x18x18x4xf32, #tpu.memory_space<vmem>>, vector<1x16x16x4xf32>
    %63 = vector.shape_cast %62 : vector<1x16x16x4xf32> to vector<16x16x4xf32>
    %64 = vector.shape_cast %63 : vector<16x16x4xf32> to vector<256x4xf32>
    %65 = arith.truncf %64 : vector<256x4xf32> to vector<256x4xbf16>
    %c0_72 = arith.constant 0 : index
    %c0_73 = arith.constant 0 : index
    %66 = vector.load %arg9[%c0_72, %c0_73] : memref<256x128xf32, #tpu.memory_space<vmem>>, vector<256x128xf32>
    %c6 = arith.constant 6 : index
    %c0_74 = arith.constant 0 : index
    %c0_75 = arith.constant 0 : index
    %67 = vector.load %arg2[%c6, %c0_74, %c0_75] : memref<9x4x128xbf16, #tpu.memory_space<vmem>>, vector<1x4x128xbf16>
    %68 = vector.shape_cast %67 : vector<1x4x128xbf16> to vector<4x128xbf16>
    %cst_76 = arith.constant dense<0.000000e+00> : vector<256x128xf32>
    %69 = tpu.matmul %65, %68, %cst_76 {dimension_numbers = #tpu.dot_dimension_numbers<[1], [0], [0], [1], [0, 0, 1, 1], [], []>} : vector<256x4xbf16>, vector<4x128xbf16>, vector<256x128xf32> -> vector<256x128xf32>
    %70 = arith.addf %66, %69 : vector<256x128xf32>
    %c0_77 = arith.constant 0 : index
    %c0_78 = arith.constant 0 : index
    %71 = vector.load %arg9[%c0_77, %c0_78] : memref<256x128xf32, #tpu.memory_space<vmem>>, vector<256x128xf32>
    tpu.vector_store %arg9[%c0_77, %c0_78], %70 {strides = array<i32>} : memref<256x128xf32, #tpu.memory_space<vmem>>, vector<256x128xf32>,
    %c0_79 = arith.constant 0 : index
    %c2_80 = arith.constant 2 : index
    %c1_81 = arith.constant 1 : index
    %c0_82 = arith.constant 0 : index
    %72 = vector.load %arg1[%c0_79, %c2_80, %c1_81, %c0_82] : memref<1x18x18x4xf32, #tpu.memory_space<vmem>>, vector<1x16x16x4xf32>
    %73 = vector.shape_cast %72 : vector<1x16x16x4xf32> to vector<16x16x4xf32>
    %74 = vector.shape_cast %73 : vector<16x16x4xf32> to vector<256x4xf32>
    %75 = arith.truncf %74 : vector<256x4xf32> to vector<256x4xbf16>
    %c0_83 = arith.constant 0 : index
    %c0_84 = arith.constant 0 : index
    %76 = vector.load %arg9[%c0_83, %c0_84] : memref<256x128xf32, #tpu.memory_space<vmem>>, vector<256x128xf32>
    %c7 = arith.constant 7 : index
    %c0_85 = arith.constant 0 : index
    %c0_86 = arith.constant 0 : index
    %77 = vector.load %arg2[%c7, %c0_85, %c0_86] : memref<9x4x128xbf16, #tpu.memory_space<vmem>>, vector<1x4x128xbf16>
    %78 = vector.shape_cast %77 : vector<1x4x128xbf16> to vector<4x128xbf16>
    %cst_87 = arith.constant dense<0.000000e+00> : vector<256x128xf32>
    %79 = tpu.matmul %75, %78, %cst_87 {dimension_numbers = #tpu.dot_dimension_numbers<[1], [0], [0], [1], [0, 0, 1, 1], [], []>} : vector<256x4xbf16>, vector<4x128xbf16>, vector<256x128xf32> -> vector<256x128xf32>
    %80 = arith.addf %76, %79 : vector<256x128xf32>
    %c0_88 = arith.constant 0 : index
    %c0_89 = arith.constant 0 : index
    %81 = vector.load %arg9[%c0_88, %c0_89] : memref<256x128xf32, #tpu.memory_space<vmem>>, vector<256x128xf32>
    tpu.vector_store %arg9[%c0_88, %c0_89], %80 {strides = array<i32>} : memref<256x128xf32, #tpu.memory_space<vmem>>, vector<256x128xf32>,
    %c0_90 = arith.constant 0 : index
    %c2_91 = arith.constant 2 : index
    %c2_92 = arith.constant 2 : index
    %c0_93 = arith.constant 0 : index
    %82 = vector.load %arg1[%c0_90, %c2_91, %c2_92, %c0_93] : memref<1x18x18x4xf32, #tpu.memory_space<vmem>>, vector<1x16x16x4xf32>
    %83 = vector.shape_cast %82 : vector<1x16x16x4xf32> to vector<16x16x4xf32>
    %84 = vector.shape_cast %83 : vector<16x16x4xf32> to vector<256x4xf32>
    %85 = arith.truncf %84 : vector<256x4xf32> to vector<256x4xbf16>
    %c0_94 = arith.constant 0 : index
    %c0_95 = arith.constant 0 : index
    %86 = vector.load %arg9[%c0_94, %c0_95] : memref<256x128xf32, #tpu.memory_space<vmem>>, vector<256x128xf32>
    %c8 = arith.constant 8 : index
    %c0_96 = arith.constant 0 : index
    %c0_97 = arith.constant 0 : index
    %87 = vector.load %arg2[%c8, %c0_96, %c0_97] : memref<9x4x128xbf16, #tpu.memory_space<vmem>>, vector<1x4x128xbf16>
    %88 = vector.shape_cast %87 : vector<1x4x128xbf16> to vector<4x128xbf16>
    %cst_98 = arith.constant dense<0.000000e+00> : vector<256x128xf32>
    %89 = tpu.matmul %85, %88, %cst_98 {dimension_numbers = #tpu.dot_dimension_numbers<[1], [0], [0], [1], [0, 0, 1, 1], [], []>} : vector<256x4xbf16>, vector<4x128xbf16>, vector<256x128xf32> -> vector<256x128xf32>
    %90 = arith.addf %86, %89 : vector<256x128xf32>
    %c0_99 = arith.constant 0 : index
    %c0_100 = arith.constant 0 : index
    %91 = vector.load %arg9[%c0_99, %c0_100] : memref<256x128xf32, #tpu.memory_space<vmem>>, vector<256x128xf32>
    tpu.vector_store %arg9[%c0_99, %c0_100], %90 {strides = array<i32>} : memref<256x128xf32, #tpu.memory_space<vmem>>, vector<256x128xf32>,
    %c0_101 = arith.constant 0 : index
    %c0_102 = arith.constant 0 : index
    %92 = vector.load %arg9[%c0_101, %c0_102] : memref<256x128xf32, #tpu.memory_space<vmem>>, vector<256x128xf32>
    %c0_103 = arith.constant 0 : index
    %c0_104 = arith.constant 0 : index
    %93 = vector.load %arg3[%c0_103, %c0_104] : memref<1x128xf32, #tpu.memory_space<vmem>>, vector<1x128xf32>
    %94 = vector.broadcast %93 : vector<1x128xf32> to vector<256x128xf32>
    %95 = arith.addf %92, %94 : vector<256x128xf32>
    %cst_105 = arith.constant 0.000000e+00 : f32
    %96 = vector.broadcast %cst_105 : f32 to vector<256x128xf32>
    %97 = arith.maximumf %95, %96 : vector<256x128xf32>
    %cst_106 = arith.constant dense<0.000000e+00> : vector<128xf32>
    %98 = vector.multi_reduction <add>, %97, %cst_106 [0] : vector<256x128xf32> to vector<128xf32>
    %99 = vector.shape_cast %98 : vector<128xf32> to vector<1x128xf32>
    %cst_107 = arith.constant 3.906250e-03 : f32
    %100 = vector.broadcast %cst_107 : f32 to vector<1x128xf32>
    %101 = arith.mulf %99, %100 : vector<1x128xf32>
    %102 = arith.truncf %101 : vector<1x128xf32> to vector<1x128xbf16>
    %c0_108 = arith.constant 0 : index
    %c0_109 = arith.constant 0 : index
    %103 = vector.load %arg4[%c0_108, %c0_109] : memref<128x128xbf16, #tpu.memory_space<vmem>>, vector<128x128xbf16>
    %cst_110 = arith.constant dense<0.000000e+00> : vector<1x128xf32>
    %104 = tpu.matmul %102, %103, %cst_110 {dimension_numbers = #tpu.dot_dimension_numbers<[1], [0], [0], [1], [0, 0, 1, 1], [], []>} : vector<1x128xbf16>, vector<128x128xbf16>, vector<1x128xf32> -> vector<1x128xf32>
    %c0_111 = arith.constant 0 : index
    %c0_112 = arith.constant 0 : index
    %105 = vector.load %arg5[%c0_111, %c0_112] : memref<1x128xf32, #tpu.memory_space<vmem>>, vector<1x128xf32>
    %106 = arith.addf %104, %105 : vector<1x128xf32>
    %cst_113 = arith.constant 0.000000e+00 : f32
    %107 = vector.broadcast %cst_113 : f32 to vector<1x128xf32>
    %108 = arith.maximumf %106, %107 : vector<1x128xf32>
    %109 = arith.truncf %108 : vector<1x128xf32> to vector<1x128xbf16>
    %c0_114 = arith.constant 0 : index
    %c0_115 = arith.constant 0 : index
    %110 = vector.load %arg6[%c0_114, %c0_115] : memref<128x128xbf16, #tpu.memory_space<vmem>>, vector<128x128xbf16>
    %cst_116 = arith.constant dense<0.000000e+00> : vector<1x128xf32>
    %111 = tpu.matmul %109, %110, %cst_116 {dimension_numbers = #tpu.dot_dimension_numbers<[1], [0], [0], [1], [0, 0, 1, 1], [], []>} : vector<1x128xbf16>, vector<128x128xbf16>, vector<1x128xf32> -> vector<1x128xf32>
    %c0_117 = arith.constant 0 : index
    %c0_118 = arith.constant 0 : index
    %112 = vector.load %arg7[%c0_117, %c0_118] : memref<1x128xf32, #tpu.memory_space<vmem>>, vector<1x128xf32>
    %113 = arith.addf %111, %112 : vector<1x128xf32>
    %c0_119 = arith.constant 0 : index
    %c0_120 = arith.constant 0 : index
    %c0_121 = arith.constant 0 : index
    %114 = vector.load %arg8[%c0_119, %c0_120, %c0_121] : memref<1x1x128xf32, #tpu.memory_space<vmem>>, vector<1x1x128xf32>
    %115 = vector.shape_cast %114 : vector<1x1x128xf32> to vector<1x128xf32>
    %116 = vector.shape_cast %113 : vector<1x128xf32> to vector<1x1x128xf32>
    tpu.vector_store %arg8[%c0_119, %c0_120, %c0_121], %116 {strides = array<i32>} : memref<1x1x128xf32, #tpu.memory_space<vmem>>, vector<1x1x128xf32>,
    return
  }
  func.func @transform_0(%arg0: i32) -> (i32, i32, i32, i32) {
    %c0_i32 = arith.constant 0 : i32
    %c0_i32_0 = arith.constant 0 : i32
    %c0_i32_1 = arith.constant 0 : i32
    %c0_i32_2 = arith.constant 0 : i32
    return %arg0, %c0_i32, %c0_i32_0, %c0_i32_1 : i32, i32, i32, i32
  }
  func.func @transform_1(%arg0: i32) -> (i32, i32, i32) {
    %c0_i32 = arith.constant 0 : i32
    %c0_i32_0 = arith.constant 0 : i32
    %c0_i32_1 = arith.constant 0 : i32
    %c0_i32_2 = arith.constant 0 : i32
    return %c0_i32, %c0_i32_0, %c0_i32_1 : i32, i32, i32
  }
  func.func @transform_2(%arg0: i32) -> (i32, i32) {
    %c0_i32 = arith.constant 0 : i32
    %c0_i32_0 = arith.constant 0 : i32
    %c0_i32_1 = arith.constant 0 : i32
    return %c0_i32, %c0_i32_0 : i32, i32
  }
  func.func @transform_3(%arg0: i32) -> (i32, i32) {
    %c0_i32 = arith.constant 0 : i32
    %c0_i32_0 = arith.constant 0 : i32
    %c0_i32_1 = arith.constant 0 : i32
    return %c0_i32, %c0_i32_0 : i32, i32
  }
  func.func @transform_4(%arg0: i32) -> (i32, i32) {
    %c0_i32 = arith.constant 0 : i32
    %c0_i32_0 = arith.constant 0 : i32
    %c0_i32_1 = arith.constant 0 : i32
    return %c0_i32, %c0_i32_0 : i32, i32
  }
  func.func @transform_5(%arg0: i32) -> (i32, i32) {
    %c0_i32 = arith.constant 0 : i32
    %c0_i32_0 = arith.constant 0 : i32
    %c0_i32_1 = arith.constant 0 : i32
    return %c0_i32, %c0_i32_0 : i32, i32
  }
  func.func @transform_6(%arg0: i32) -> (i32, i32) {
    %c0_i32 = arith.constant 0 : i32
    %c0_i32_0 = arith.constant 0 : i32
    %c0_i32_1 = arith.constant 0 : i32
    return %c0_i32, %c0_i32_0 : i32, i32
  }
  func.func @transform_7(%arg0: i32) -> (i32, i32, i32) {
    %c0_i32 = arith.constant 0 : i32
    %c0_i32_0 = arith.constant 0 : i32
    %c0_i32_1 = arith.constant 0 : i32
    return %arg0, %c0_i32, %c0_i32_0 : i32, i32, i32
  }
}

</mosaic_0001>

<bundles_post_ra>
// kernel: simclr_ft_forward.1
= control target key start
LH: loop header
LB: loop body
LE: loop exit
PB: predicated region body
PF: predicated region fallthrough
CT: control target
= control target key end

     0   :  { %12 = vsyncpa [#allocation4], 0  ;;  %s4722_s0 = inlined_call_operand.vmem [shape: f32[2,18,18,4], index: 0, kind: input, shape index: {}]   ;;  %s4723_s1 = inlined_call_operand.vmem [shape: bf16[9,4,128], index: 1, kind: input, shape index: {}]   ;;  %s4724_s2 = inlined_call_operand.vmem [shape: f32[1,128], index: 2, kind: input, shape index: {}]   ;;  %s4725_s3 = inlined_call_operand.vmem [shape: bf16[128,128], index: 3, kind: input, shape index: {}]   ;;  %s4726_s4 = inlined_call_operand.vmem [shape: f32[1,128], index: 4, kind: input, shape index: {}]   ;;  %s4727_s5 = inlined_call_operand.vmem [shape: bf16[128,128], index: 5, kind: input, shape index: {}]   ;;  %s4728_s6 = inlined_call_operand.vmem [shape: f32[1,128], index: 6, kind: input, shape index: {}]   ;;  %s4729_s7 = inlined_call_operand.hbm [shape: f32[2,1,128], index: 7, kind: output, shape index: {}]  }
   0x1   :  { %14 = vsyncpa [#allocation4 + $0x1], 0  ;;  %s3831_s24 = smov 0   ;;  %s3833_s25 = smov 0  }
   0x2   :  { %s3835_s26 = smov 0   ;;  %s3837_s27 = smov 0  }
   0x3 LB: > { %s3852_s28 = sadd.s32 4294967295, %s3789_s27   ;;  %s3252_s29 = sadd.s32 4294967294, %s3789_s27   ;;  %s3789_s27 = sphi %s3837_s27, %s4799_s27   ;;  %s3785_s26 = sphi %s3835_s26, %s4798_s26   ;;  %s3781_s25 = sphi %s3833_s25, %s4797_s25   ;;  %s3777_s24 = sphi %s3831_s24, %s4796_s24  }
   0x4   : > { %s3856_s30 = sadd.s32 1, %s3789_s27   ;;  %s179_s8 = sadd.s32 1, %s3785_s26 }
   0x5   : > { %s176_s9 = ssub.s32 %s3789_s27, %s3856_s30  ;;  %p189_p0 = scmp.ne.s32.totalorder %s3785_s26, %s3781_s25 }
   0x6   : > { %p177_p1 = scmp.eq.s32.totalorder %s176_s9, 0  ;;  %p190_p2 = scmp.eq.s32.totalorder %s3852_s28, 1 }
   0x7   : > { %p195_p3 = scmp.ne.s32.totalorder %s3781_s25, %s3777_s24  ;;  %p196_p4 = scmp.eq.s32.totalorder %s3252_s29, 1 }
   0x8   : > { %s3867_s10 = scalar_select %p177_p1, %s3785_s26, %s179_s8  }
   0x9   : > { %p3869_p5 = por %p190_p2, %p189_p0  ;;  %p3873_p6 = por %p196_p4, %p195_p3 }
   0xa   : > { %p3255_p7 = scmp.ge.s32.totalorder %s3789_s27, 1  ;;  %p240_p8 = scmp.lt.s32.totalorder %s3789_s27, 3 }
   0xc   : > { %p241_p9 = pnand %p3255_p7, %p240_p8 }
   0xe   : > { %244 = sbr.rel (%p241_p9) target bundleno = 1044 (0x414), region = 48 }
  0x13   : > { %v389_v0 = vld [vmem:[%s4723_s1] sm:$0x3]  ;;  %vm439_vm0 = vcmask 1041408   ;;  %p271_p10 = scmp.lt.s32.totalorder %s3852_s28, 1  ;;  %v3339_v2 = vld [vmem:[%s4723_s1 + $0x6] sm:$0x3] }
  0x14   : > { %v441_v1 = vsel %vm439_vm0, %v389_v0, 0  ;;  %v3388_v3 = vld [vmem:[%s4723_s1 + $0x8] sm:$0x3]  ;;  %v1300_v4 = vsel %vm439_vm0, %v3339_v2, 0  ;;  %v3273_v6 = vld [vmem:[%s4723_s1 + $0x2] sm:$0x3] }
  0x15   : > { %450 = vmatpush.bf16.msra.mxu0 %v441_v1  ;;  %3683 = vmatpush.bf16.msra.mxu1 %v441_v1  ;;  %s272_s19 = scalar_select %p271_p10, %s3852_s28, 1  ;;  %v1586_v5 = vsel %vm439_vm0, %v3388_v3, 0  ;;  %v727_v7 = vsel %vm439_vm0, %v3273_v6, 0  ;;  %vm390_vm1 = vcmask 31744   ;;  %v3290_v20 = vld [vmem:[%s4723_s1 + $0x4] sm:$0x3] }
  0x16   : > { %3685 = vmatpush.bf16.msra.mxu3 %v441_v1  ;;  %3684 = vmatpush.bf16.msra.mxu2 %v441_v1  ;;  %v1013_v21 = vsel %vm439_vm0, %v3290_v20, 0  ;;  %v3486_v46 = vld [vmem:[%s4723_s1 + $0xc] sm:$0x3]  ;;  %v3535_v60 = vld [vmem:[%s4723_s1 + $0xe] sm:$0x3]  ;;  %s269_s17 = sand.u32 1, %s3781_s25  }
  0x17   : > { %s3686_s22 = smul.u32 432, %s272_s19  ;;  %v2159_v47 = vsel %vm439_vm0, %v3486_v46, 0  ;;  %v3437_v61 = vld [vmem:[%s4723_s1 + $0xa] sm:$0x3]  ;;  %v3584_v62 = vld [vmem:[%s4723_s1 + $0x10] sm:$0x3]  ;;  %s3193_s19 = scalar_lea.hbm %s4729_s7, %s3852_s28 }
  0x18   : > { %v2445_v63 = vsel %vm439_vm0, %v3535_v60, 0  ;;  %v1872_v0 = vsel %vm439_vm0, %v3437_v61, 0  ;;  %v2731_v1 = vsel %vm439_vm0, %v3584_v62, 0  ;;  %s3197_s29 = sshll.u32 %s3193_s19, 4  ;;  %s3185_s9 = scalar_lea.sflag [#allocation4], %s269_s17  ;;  %s3198_s29 = int_to_ptr.hbm [resolvable:$true] %s3197_s29 }
  0x19   : > { %1595 = vmatpush.bf16.msrb.mxu0 %v1586_v5  ;;  %736 = vmatpush.bf16.msrb.mxu1 %v727_v7  ;;  %s3900_s8 = scalar_lea.vmem %s4722_s0, %s3686_s22  ;;  %s270_s22 = scalar_lea.vmem [#allocation3], %s269_s17 }
  0x1a   : > { %1309 = vmatpush.bf16.msrb.mxu3 %v1300_v4  ;;  %v309_v8 = vld [vmem:[%s3900_s8] sm:$0xff]  ;;  %v310_v9 = vld [vmem:[%s3900_s8 + $0x8] sm:$0xff]  ;;  %v319_v10 = vld [vmem:[%s3900_s8 + $0x78] sm:$0xff]  ;;  %1022 = vmatpush.bf16.msrb.mxu2 %v1013_v21  ;;  %s3195_s23 = sshll.u32 %s270_s22, 4  ;;  %s3741_s13 = sshra.s32 %s3198_s29, 4  ;;  %s3196_s23 = int_to_ptr.vmem [resolvable:$true] %s3195_s23  ;;  %s3742_s13 = int_to_ptr.hbm [resolvable:$true] %s3741_s13 }
  0x1b   : > { %v341_v11 = vpack.c.bf16 %v310_v9, %v309_v8  ;;  %v320_v12 = vld [vmem:[%s3900_s8 + $0x80] sm:$0xff]  ;;  %v331_v13 = vld [vmem:[%s3900_s8 + $0x108] sm:$0xff]  ;;  %v332_v14 = vld [vmem:[%s3900_s8 + $0x110] sm:$0xff]  ;;  %s3743_s14 = scalar_lea.hbm %s3742_s13, 1  ;;  %s3747_s16 = scalar_lea.hbm %s4729_s7, 2 }
  0x1c   : > { %v3908_v15 = vpack.c.bf16 %v320_v12, %v319_v10  ;;  %v3910_v16 = vpack.c.bf16 %v332_v14, %v331_v13  ;;  %v327_v17 = vld [vmem:[%s3900_s8 + $0xd8] sm:$0xff]  ;;  %v328_v18 = vld [vmem:[%s3900_s8 + $0xe0] sm:$0xff]  ;;  %v321_v24 = vld [vmem:[%s3900_s8 + $0x90] sm:$0xff]  ;;  %p3744_p11 = scmp.ne.s32.totalorder %s3742_s13, %s3743_s14  ;;  %p3748_p0 = scmp.lt.s32.totalorder %s3742_s13, %s4729_s7 }
  0x1d   : > { %3257 = vmatmul.msk.bf16.vlgmr.msra.gmra.mxu0 %vm390_vm1, %v341_v11  ;;  %v3919_v19 = vpack.c.bf16 %v328_v18, %v327_v17  ;;  %v311_v22 = vld [vmem:[%s3900_s8 + $0x18] sm:$0xff]  ;;  %v312_v23 = vld [vmem:[%s3900_s8 + $0x20] sm:$0xff]  ;;  %v334_v27 = vld [vmem:[%s3900_s8 + $0x128] sm:$0xff]  ;;  %p3749_p1 = scmp.lt.s32.totalorder %s3747_s16, %s3743_s14 }
  0x1e   : > { %3262 = vmatmul.msk.bf16.vlgmr.msra.gmra.mxu1 %vm390_vm1, %v3908_v15  ;;  %3268 = vmatmul.msk.bf16.vlgmr.msra.gmra.mxu3 %vm390_vm1, %v3910_v16  ;;  %v322_v25 = vld [vmem:[%s3900_s8 + $0x98] sm:$0xff]  ;;  %v333_v26 = vld [vmem:[%s3900_s8 + $0x120] sm:$0xff]  ;;  %v3933_v28 = vpack.c.bf16 %v312_v23, %v311_v22  ;;  %v329_v31 = vld [vmem:[%s3900_s8 + $0xf0] sm:$0xff]  ;;  %p3745_p12 = pnand %p3744_p11, %p3869_p5 }
  0x1f   : > { %3266 = vmatmul.msk.bf16.vlgmr.msra.gmra.mxu2 %vm390_vm1, %v3919_v19  ;;  %v3935_v29 = vpack.c.bf16 %v322_v25, %v321_v24  ;;  %v3937_v30 = vpack.c.bf16 %v334_v27, %v333_v26  ;;  %v330_v32 = vld [vmem:[%s3900_s8 + $0xf8] sm:$0xff]  ;;  %v313_v34 = vld [vmem:[%s3900_s8 + $0x30] sm:$0xff]  ;;  %v323_v36 = vld [vmem:[%s3900_s8 + $0xa8] sm:$0xff]  ;;  %2454 = vmatpush.bf16.msra.mxu3 %v2445_v63  ;;  %p3750_p2 = por %p3749_p1, %p3748_p0 }
  0x20   : > { %v3943_v33 = vpack.c.bf16 %v330_v32, %v329_v31  ;;  %v314_v35 = vld [vmem:[%s3900_s8 + $0x38] sm:$0xff]  ;;  %v324_v37 = vld [vmem:[%s3900_s8 + $0xb0] sm:$0xff]  ;;  %v336_v39 = vld [vmem:[%s3900_s8 + $0x140] sm:$0xff]  ;;  %2168 = vmatpush.bf16.msra.mxu2 %v2159_v47  ;;  %1881 = vmatpush.bf16.msra.mxu1 %v1872_v0  ;;  %p3746_p13 = pneg %p3745_p12 }
  0x21   : > { %v335_v38 = vld [vmem:[%s3900_s8 + $0x138] sm:$0xff]  ;;  %v3957_v40 = vpack.c.bf16 %v314_v35, %v313_v34  ;;  %v3959_v41 = vpack.c.bf16 %v324_v37, %v323_v36  ;;  %v882_v43 = vld [vmem:[%s3900_s8 + $0x2] sm:$0xff]  ;;  %v883_v44 = vld [vmem:[%s3900_s8 + $0xa] sm:$0xff]  ;;  %2740 = vmatpush.bf16.msra.mxu0 %v2731_v1 }
  0x22   : > { %v3961_v42 = vpack.c.bf16 %v336_v39, %v335_v38  ;;  %v914_v45 = vpack.c.bf16 %v883_v44, %v882_v43  ;;  %v315_v48 = vld [vmem:[%s3900_s8 + $0x48] sm:$0xff]  ;;  %v316_v49 = vld [vmem:[%s3900_s8 + $0x50] sm:$0xff]  ;;  %v325_v50 = vld [vmem:[%s3900_s8 + $0xc0] sm:$0xff]  ;;  %p3751_p3 = pnand %p3750_p2, %p3746_p13 }
  0x23   : > { %v326_v51 = vld [vmem:[%s3900_s8 + $0xc8] sm:$0xff]  ;;  %v337_v52 = vld [vmem:[%s3900_s8 + $0x150] sm:$0xff]  ;;  %v338_v53 = vld [vmem:[%s3900_s8 + $0x158] sm:$0xff]  ;;  %v3982_v54 = vpack.c.bf16 %v316_v49, %v315_v48 }
  0x24   : > { %v3984_v55 = vpack.c.bf16 %v326_v51, %v325_v50  ;;  %v3986_v56 = vpack.c.bf16 %v338_v53, %v337_v52  ;;  %v884_v57 = vld [vmem:[%s3900_s8 + $0x1a] sm:$0xff]  ;;  %v885_v58 = vld [vmem:[%s3900_s8 + $0x22] sm:$0xff]  ;;  %v340_v5 = vld [vmem:[%s3900_s8 + $0x170] sm:$0xff] }
  0x25   : > { %v3992_v59 = vpack.c.bf16 %v885_v58, %v884_v57  ;;  %v317_v2 = vld [vmem:[%s3900_s8 + $0x60] sm:$0xff]  ;;  %v318_v3 = vld [vmem:[%s3900_s8 + $0x68] sm:$0xff]  ;;  %v886_v11 = vld [vmem:[%s3900_s8 + $0x32] sm:$0xff] }
  0x26   : > { %v339_v4 = vld [vmem:[%s3900_s8 + $0x168] sm:$0xff]  ;;  %v4018_v8 = vpack.c.bf16 %v318_v3, %v317_v2  ;;  %v887_v12 = vld [vmem:[%s3900_s8 + $0x3a] sm:$0xff]  ;;  %v889_v21 = vld [vmem:[%s3900_s8 + $0x52] sm:$0xff] }
  0x27   : > { %v596_v6 = vld [vmem:[%s3900_s8 + $0x1] sm:$0xff]  ;;  %v597_v7 = vld [vmem:[%s3900_s8 + $0x9] sm:$0xff]  ;;  %v4020_v9 = vpack.c.bf16 %v340_v5, %v339_v4  ;;  %v4026_v13 = vpack.c.bf16 %v887_v12, %v886_v11  ;;  %v598_v14 = vld [vmem:[%s3900_s8 + $0x19] sm:$0xff] }
  0x28   : > { %v628_v10 = vpack.c.bf16 %v597_v7, %v596_v6  ;;  %v599_v17 = vld [vmem:[%s3900_s8 + $0x21] sm:$0xff]  ;;  %v888_v20 = vld [vmem:[%s3900_s8 + $0x4a] sm:$0xff]  ;;  %v601_v24 = vld [vmem:[%s3900_s8 + $0x39] sm:$0xff] }
  0x29   : > { %v629_v18 = vpack.c.bf16 %v599_v17, %v598_v14  ;;  %v4038_v22 = vpack.c.bf16 %v889_v21, %v888_v20  ;;  %v600_v23 = vld [vmem:[%s3900_s8 + $0x31] sm:$0xff]  ;;  %v890_v26 = vld [vmem:[%s3900_s8 + $0x62] sm:$0xff]  ;;  %v892_v35 = vld [vmem:[%s3900_s8 + $0x7a] sm:$0xff] }
  0x2a   : > { %v4047_v25 = vpack.c.bf16 %v601_v24, %v600_v23  ;;  %v891_v27 = vld [vmem:[%s3900_s8 + $0x6a] sm:$0xff]  ;;  %v893_v36 = vld [vmem:[%s3900_s8 + $0x82] sm:$0xff]  ;;  %v895_v46 = vld [vmem:[%s3900_s8 + $0x9a] sm:$0xff] }
  0x2b   : > { %v4053_v31 = vpack.c.bf16 %v891_v27, %v890_v26  ;;  %v603_v32 = vld [vmem:[%s3900_s8 + $0x51] sm:$0xff]  ;;  %v4069_v37 = vpack.c.bf16 %v893_v36, %v892_v35  ;;  %v604_v38 = vld [vmem:[%s3900_s8 + $0x61] sm:$0xff]  ;;  %v605_v39 = vld [vmem:[%s3900_s8 + $0x69] sm:$0xff] }
  0x2c   : > { %v4079_v43 = vpack.c.bf16 %v605_v39, %v604_v38  ;;  %v606_v53 = vld [vmem:[%s3900_s8 + $0x79] sm:$0xff]  ;;  %v607_v57 = vld [vmem:[%s3900_s8 + $0x81] sm:$0xff]  ;;  %v896_v62 = vld [vmem:[%s3900_s8 + $0xaa] sm:$0xff] }
  0x2d   : > { %3258 = vmatmul.msk.bf16.gmra.mxu0 %vm390_vm1, %v3933_v28  ;;  %v4109_v60 = vpack.c.bf16 %v607_v57, %v606_v53  ;;  %v897_v63 = vld [vmem:[%s3900_s8 + $0xb2] sm:$0xff]  ;;  %v898_v14 = vld [vmem:[%s3900_s8 + $0xc2] sm:$0xff]  ;;  %v899_v17 = vld [vmem:[%s3900_s8 + $0xca] sm:$0xff] }
  0x2e   : > { %3263 = vmatmul.msk.bf16.gmra.mxu1 %vm390_vm1, %v3935_v29  ;;  %3269 = vmatmul.msk.bf16.gmra.mxu3 %vm390_vm1, %v3937_v30  ;;  %v4121_v2 = vpack.c.bf16 %v897_v63, %v896_v62  ;;  %v608_v7 = vld [vmem:[%s3900_s8 + $0x91] sm:$0xff]  ;;  %v4153_v21 = vpack.c.bf16 %v899_v17, %v898_v14  ;;  %v901_v39 = vld [vmem:[%s3900_s8 + $0xe2] sm:$0xff] }
  0x2f   : > { %3267 = vmatmul.msk.bf16.gmra.mxu2 %vm390_vm1, %v3943_v33  ;;  %4755 = vst [vmem:[#allocation7_spill] sm:$0xff] %v4109_v60  ;;  %v613_v14 = vld [vmem:[%s3900_s8 + $0xc9] sm:$0xff] }
  0x30   : > { %4756 = vst [vmem:[#allocation8_spill] sm:$0xff] %v4121_v2 }
  0x31   : > { %4759 = vst [vmem:[#allocation11_spill] sm:$0xff] %v4153_v21 }
  0x3d   : > { %3259 = vmatmul.msk.bf16.gmra.mxu0 %vm390_vm1, %v3957_v40 }
  0x3e   : > { %3264 = vmatmul.msk.bf16.gmra.mxu1 %vm390_vm1, %v3959_v41  ;;  %3270 = vmatmul.msk.bf16.gmra.mxu3 %vm390_vm1, %v3961_v42 }
  0x3f   : > { %3291 = vmatmul.msk.bf16.vlgmr.msrb.gmra.mxu2 %vm390_vm1, %v914_v45  ;;  %v894_v45 = vld [vmem:[%s3900_s8 + $0x92] sm:$0xff] }
  0x40   : > { %v4089_v48 = vpack.c.bf16 %v895_v46, %v894_v45 }
  0x42   : > { %4754 = vst [vmem:[#allocation6_spill] sm:$0xff] %v4089_v48 }
  0x4d   : > { %3260 = vmatmul.msk.bf16.gmra.mxu0 %vm390_vm1, %v3982_v54 }
  0x4e   : > { %3265 = vmatmul.msk.bf16.gmra.mxu1 %vm390_vm1, %v3984_v55  ;;  %3271 = vmatmul.msk.bf16.gmra.mxu3 %vm390_vm1, %v3986_v56 }
  0x4f   : > { %3292 = vmatmul.msk.bf16.gmra.mxu2 %vm390_vm1, %v3992_v59 }
  0x5d   : > { %3261 = vmatmul.msk.bf16.gmra.mxu0 %vm390_vm1, %v4018_v8 }
  0x5e   : > { %3272 = vmatmul.msk.bf16.gmra.mxu3 %vm390_vm1, %v4020_v9  ;;  %3274 = vmatmul.msk.bf16.vlgmr.msrb.gmra.mxu1 %vm390_vm1, %v628_v10  ;;  %v609_v10 = vld [vmem:[%s3900_s8 + $0x99] sm:$0xff] }
  0x5f   : > { %3293 = vmatmul.msk.bf16.gmra.mxu2 %vm390_vm1, %v4026_v13  ;;  %v4141_v12 = vpack.c.bf16 %v609_v10, %v608_v7  ;;  %v612_v10 = vld [vmem:[%s3900_s8 + $0xc1] sm:$0xff] }
  0x61   : > { %4758 = vst [vmem:[#allocation10_spill] sm:$0xff] %v4141_v12 }
  0x6d   : > { %3389 = vmatmul.msk.bf16.vlgmr.msrb.gmra.mxu0 %vm390_vm1, %v629_v18 }
  0x6e   : > { %3275 = vmatmul.msk.bf16.gmra.mxu1 %vm390_vm1, %v629_v18  ;;  %3340 = vmatmul.msk.bf16.vlgmr.msrb.gmra.mxu3 %vm390_vm1, %v3933_v28  ;;  %v602_v28 = vld [vmem:[%s3900_s8 + $0x49] sm:$0xff] }
  0x6f   : > { %3294 = vmatmul.msk.bf16.gmra.mxu2 %vm390_vm1, %v4038_v22  ;;  %v4063_v34 = vpack.c.bf16 %v603_v32, %v602_v28  ;;  %v610_v28 = vld [vmem:[%s3900_s8 + $0xa9] sm:$0xff]  ;;  %v611_v32 = vld [vmem:[%s3900_s8 + $0xb1] sm:$0xff] }
  0x70   : > { %v4171_v36 = vpack.c.bf16 %v611_v32, %v610_v28  ;;  %v4199_v28 = vpack.c.bf16 %v613_v14, %v612_v10 }
  0x72   : > { %4762 = vst [vmem:[#allocation14_spill] sm:$0xff] %v4171_v36 }
  0x73   : > { %4766 = vst [vmem:[#allocation18_spill] sm:$0xff] %v4199_v28 }
  0x7d   : > { %3390 = vmatmul.msk.bf16.gmra.mxu0 %vm390_vm1, %v4047_v25 }
  0x7e   : > { %3276 = vmatmul.msk.bf16.gmra.mxu1 %vm390_vm1, %v4047_v25  ;;  %3341 = vmatmul.msk.bf16.gmra.mxu3 %vm390_vm1, %v3957_v40 }
  0x7f   : > { %3295 = vmatmul.msk.bf16.gmra.mxu2 %vm390_vm1, %v4053_v31 }
  0x8d   : > { %3391 = vmatmul.msk.bf16.gmra.mxu0 %vm390_vm1, %v4063_v34 }
  0x8e   : > { %3277 = vmatmul.msk.bf16.gmra.mxu1 %vm390_vm1, %v4063_v34  ;;  %3342 = vmatmul.msk.bf16.gmra.mxu3 %vm390_vm1, %v3982_v54 }
  0x8f   : > { %3296 = vmatmul.msk.bf16.gmra.mxu2 %vm390_vm1, %v4069_v37 }
  0x9a   : > { %v4081_v44 = vpop.f32.mrf.mxu0 }
  0x9b   : > { %v4085_v47 = vpop.f32.mrf.mxu1 }
  0x9d   : > { %3392 = vmatmul.msk.bf16.gmra.mxu0 %vm390_vm1, %v4079_v43 }
  0x9e   : > { %3278 = vmatmul.msk.bf16.gmra.mxu1 %vm390_vm1, %v4079_v43  ;;  %3343 = vmatmul.msk.bf16.gmra.mxu3 %vm390_vm1, %v4018_v8 }
  0x9f   : > { %3297 = vmatmul.msk.bf16.gmra.mxu2 %vm390_vm1, %v4089_v48 }
  0xa1   : > { %v4095_v49 = vpop.f32.mrf.mxu3 }
  0xa2   : > { %v4099_v50 = vpop.f32.mrf.mxu0  ;;  %v4103_v52 = vpop.f32.mrf.mxu2 }
  0xa3   : > { %v4101_v51 = vpop.f32.mrf.mxu1 }
  0xa9   : > { %v4107_v58 = vpop.f32.mrf.mxu3 }
  0xaa   : > { %v4111_v61 = vpop.f32.mrf.mxu0  ;;  %v4117_v1 = vpop.f32.mrf.mxu2 }
  0xab   : > { %v4115_v0 = vpop.f32.mrf.mxu1 }
  0xad   : > { %3393 = vmatmul.msk.bf16.gmra.mxu0 %vm390_vm1, %v4109_v60 }
  0xae   : > { %3279 = vmatmul.msk.bf16.gmra.mxu1 %vm390_vm1, %v4109_v60  ;;  %3344 = vmatmul.msk.bf16.gmra.mxu3 %vm390_vm1, %v3908_v15 }
  0xaf   : > { %3298 = vmatmul.msk.bf16.gmra.mxu2 %vm390_vm1, %v4121_v2 }
  0xb1   : > { %v4127_v3 = vpop.f32.mrf.mxu3 }
  0xb2   : > { %v4131_v4 = vpop.f32.mrf.mxu0  ;;  %v4135_v6 = vpop.f32.mrf.mxu2 }
  0xb3   : > { %v4133_v5 = vpop.f32.mrf.mxu1 }
  0xb9   : > { %v4139_v11 = vpop.f32.mrf.mxu3 }
  0xba   : > { %4757 = vst [vmem:[#allocation9_spill] sm:$0xff] %v4139_v11  ;;  %v4143_v15 = vpop.f32.mrf.mxu0  ;;  %v4149_v20 = vpop.f32.mrf.mxu2  ;;  %v907_v11 = vld [vmem:[%s3900_s8 + $0x12a] sm:$0xff] }
  0xbb   : > { %v4147_v18 = vpop.f32.mrf.mxu1 }
  0xbd   : > { %3394 = vmatmul.msk.bf16.gmra.mxu0 %vm390_vm1, %v4141_v12 }
  0xbe   : > { %3280 = vmatmul.msk.bf16.gmra.mxu1 %vm390_vm1, %v4141_v12  ;;  %3345 = vmatmul.msk.bf16.gmra.mxu3 %vm390_vm1, %v3935_v29  ;;  %v900_v29 = vld [vmem:[%s3900_s8 + $0xda] sm:$0xff] }
  0xbf   : > { %3299 = vmatmul.msk.bf16.gmra.mxu2 %vm390_vm1, %v4153_v21  ;;  %v4181_v53 = vpack.c.bf16 %v901_v39, %v900_v29  ;;  %v902_v29 = vld [vmem:[%s3900_s8 + $0xf2] sm:$0xff] }
  0xc1   : > { %v4159_v23 = vpop.f32.mrf.mxu3  ;;  %4763 = vst [vmem:[#allocation15_spill] sm:$0xff] %v4181_v53 }
  0xc2   : > { %4760 = vst [vmem:[#allocation12_spill] sm:$0xff] %v4159_v23  ;;  %v4163_v24 = vpop.f32.mrf.mxu0  ;;  %v1024_v27 = vpop.f32.mrf.mxu2  ;;  %v906_v23 = vld [vmem:[%s3900_s8 + $0x122] sm:$0xff] }
  0xc3   : > { %v4165_v26 = vpop.f32.mrf.mxu1 }
  0xc9   : > { %v4169_v35 = vpop.f32.mrf.mxu3 }
  0xca   : > { %4761 = vst [vmem:[#allocation13_spill] sm:$0xff] %v4169_v35  ;;  %v4173_v38 = vpop.f32.mrf.mxu0  ;;  %v1026_v46 = vpop.f32.mrf.mxu2  ;;  %v905_v35 = vld [vmem:[%s3900_s8 + $0x112] sm:$0xff] }
  0xcb   : > { %v4177_v45 = vpop.f32.mrf.mxu1 }
  0xcd   : > { %3395 = vmatmul.msk.bf16.gmra.mxu0 %vm390_vm1, %v4171_v36 }
  0xce   : > { %3281 = vmatmul.msk.bf16.gmra.mxu1 %vm390_vm1, %v4171_v36  ;;  %3346 = vmatmul.msk.bf16.gmra.mxu3 %vm390_vm1, %v3959_v41  ;;  %v903_v41 = vld [vmem:[%s3900_s8 + $0xfa] sm:$0xff] }
  0xcf   : > { %3300 = vmatmul.msk.bf16.gmra.mxu2 %vm390_vm1, %v4181_v53  ;;  %v4208_v36 = vpack.c.bf16 %v903_v41, %v902_v29 }
  0xd1   : > { %v4187_v57 = vpop.f32.mrf.mxu3  ;;  %4767 = vst [vmem:[#allocation19_spill] sm:$0xff] %v4208_v36 }
  0xd2   : > { %4764 = vst [vmem:[#allocation16_spill] sm:$0xff] %v4187_v57  ;;  %v4191_v62 = vpop.f32.mrf.mxu0  ;;  %v1029_v7 = vpop.f32.mrf.mxu2 }
  0xd3   : > { %v4193_v63 = vpop.f32.mrf.mxu1 }
  0xd9   : > { %v4197_v17 = vpop.f32.mrf.mxu3 }
  0xda   : > { %4765 = vst [vmem:[#allocation17_spill] sm:$0xff] %v4197_v17  ;;  %v4201_v32 = vpop.f32.mrf.mxu0  ;;  %v1031_v21 = vpop.f32.mrf.mxu2 }
  0xdb   : > { %v738_v39 = vpop.f32.mrf.mxu1 }
  0xdc   : > { %v818_v53 = vadd.f32 %v738_v39, %v4081_v44 }
  0xdd   : > { %3396 = vmatmul.msk.bf16.gmra.mxu0 %vm390_vm1, %v4199_v28 }
  0xde   : > { %v1104_v2 = vadd.f32 %v1024_v27, %v818_v53  ;;  %3282 = vmatmul.msk.bf16.gmra.mxu1 %vm390_vm1, %v4199_v28  ;;  %3347 = vmatmul.msk.bf16.gmra.mxu3 %vm390_vm1, %v3984_v55  ;;  %v614_v27 = vld [vmem:[%s3900_s8 + $0xd9] sm:$0xff]  ;;  %v615_v53 = vld [vmem:[%s3900_s8 + $0xe1] sm:$0xff]  ;;  %v904_v55 = vld [vmem:[%s3900_s8 + $0x10a] sm:$0xff] }
  0xdf   : > { %3301 = vmatmul.msk.bf16.gmra.mxu2 %vm390_vm1, %v4208_v36  ;;  %v4225_v28 = vpack.c.bf16 %v615_v53, %v614_v27 }
  0xe1   : > { %v4214_v10 = vpop.f32.mrf.mxu3  ;;  %4770 = vst [vmem:[#allocation22_spill] sm:$0xff] %v4225_v28 }
  0xe2   : > { %4768 = vst [vmem:[#allocation20_spill] sm:$0xff] %v4214_v10  ;;  %v4218_v44 = vpop.f32.mrf.mxu0  ;;  %v1034_v41 = vpop.f32.mrf.mxu2 }
  0xe3   : > { %v740_v14 = vpop.f32.mrf.mxu1 }
  0xe4   : > { %v819_v29 = vadd.f32 %v740_v14, %v4099_v50  ;;  %v4232_v50 = vpack.c.bf16 %v905_v35, %v904_v55  ;;  %v617_v55 = vld [vmem:[%s3900_s8 + $0xf9] sm:$0xff] }
  0xe6   : > { %v1105_v39 = vadd.f32 %v1026_v46, %v819_v29  ;;  %4771 = vst [vmem:[#allocation23_spill] sm:$0xff] %v4232_v50 }
  0xe9   : > { %v4223_v17 = vpop.f32.mrf.mxu3 }
  0xea   : > { %4769 = vst [vmem:[#allocation21_spill] sm:$0xff] %v4223_v17  ;;  %v1597_v57 = vpop.f32.mrf.mxu0  ;;  %v1036_v36 = vpop.f32.mrf.mxu2 }
  0xeb   : > { %v743_v10 = vpop.f32.mrf.mxu1 }
  0xec   : > { %v820_v12 = vadd.f32 %v743_v10, %v4111_v61 }
  0xed   : > { %3397 = vmatmul.msk.bf16.gmra.mxu0 %vm390_vm1, %v4225_v28 }
  0xee   : > { %v1106_v46 = vadd.f32 %v1029_v7, %v820_v12  ;;  %3283 = vmatmul.msk.bf16.gmra.mxu1 %vm390_vm1, %v4225_v28  ;;  %3348 = vmatmul.msk.bf16.gmra.mxu3 %vm390_vm1, %v3919_v19  ;;  %v616_v7 = vld [vmem:[%s3900_s8 + $0xf1] sm:$0xff] }
  0xef   : > { %3302 = vmatmul.msk.bf16.gmra.mxu2 %vm390_vm1, %v4232_v50  ;;  %v4245_v17 = vpack.c.bf16 %v617_v55, %v616_v7  ;;  %v908_v55 = vld [vmem:[%s3900_s8 + $0x13a] sm:$0xff] }
  0xf1   : > { %v1311_v14 = vpop.f32.mrf.mxu3 }
  0xf2   : > { %v1391_v61 = vadd.f32 %v1311_v14, %v1104_v2  ;;  %v1599_v10 = vpop.f32.mrf.mxu0  ;;  %v1039_v35 = vpop.f32.mrf.mxu2 }
  0xf3   : > { %v745_v29 = vpop.f32.mrf.mxu1 }
  0xf4   : > { %v821_v27 = vadd.f32 %v745_v29, %v4131_v4  ;;  %v4241_v53 = vadd.f32 %v1597_v57, %v1391_v61  ;;  %v4254_v4 = vpack.c.bf16 %v907_v11, %v906_v23  ;;  %v618_v61 = vld [vmem:[%s3900_s8 + $0x109] sm:$0xff] }
  0xf6   : > { %v1107_v12 = vadd.f32 %v1031_v21, %v821_v27  ;;  %4772 = vst [vmem:[#allocation24_spill] sm:$0xff] %v4254_v4 }
  0xf9   : > { %v1313_v28 = vpop.f32.mrf.mxu3 }
  0xfa   : > { %v1392_v19 = vadd.f32 %v1313_v28, %v1105_v39  ;;  %v1602_v48 = vpop.f32.mrf.mxu0  ;;  %v1041_v14 = vpop.f32.mrf.mxu2 }
  0xfb   : > { %v748_v60 = vpop.f32.mrf.mxu1 }
  0xfc   : > { %v822_v2 = vadd.f32 %v748_v60, %v4143_v15  ;;  %v4250_v50 = vadd.f32 %v1599_v10, %v1392_v19  ;;  %v619_v10 = vld [vmem:[%s3900_s8 + $0x111] sm:$0xff]  ;;  %v909_v19 = vld [vmem:[%s3900_s8 + $0x142] sm:$0xff] }
  0xfd   : > { %3398 = vmatmul.msk.bf16.gmra.mxu0 %vm390_vm1, %v4245_v17  ;;  %v4267_v27 = vpack.c.bf16 %v619_v10, %v618_v61  ;;  %v620_v61 = vld [vmem:[%s3900_s8 + $0x121] sm:$0xff]  ;;  %v621_v10 = vld [vmem:[%s3900_s8 + $0x129] sm:$0xff] }
  0xfe   : > { %v1108_v21 = vadd.f32 %v1034_v41, %v822_v2  ;;  %3284 = vmatmul.msk.bf16.gmra.mxu1 %vm390_vm1, %v4245_v17  ;;  %3349 = vmatmul.msk.bf16.gmra.mxu3 %vm390_vm1, %v3943_v33 }
  0xff   : > { %3303 = vmatmul.msk.bf16.gmra.mxu2 %vm390_vm1, %v4254_v4 }
 0x101   : > { %v1316_v57 = vpop.f32.mrf.mxu3 }
 0x102   : > { %v1393_v60 = vadd.f32 %v1316_v57, %v1106_v46  ;;  %v1604_v15 = vpop.f32.mrf.mxu0  ;;  %v1044_v11 = vpop.f32.mrf.mxu2 }
 0x103   : > { %v750_v28 = vpop.f32.mrf.mxu1 }
 0x104   : > { %v823_v39 = vadd.f32 %v750_v28, %v4163_v24  ;;  %v4263_v23 = vadd.f32 %v1602_v48, %v1393_v60  ;;  %v4276_v48 = vpack.c.bf16 %v909_v19, %v908_v55  ;;  %v910_v19 = vld [vmem:[%s3900_s8 + $0x152] sm:$0xff] }
 0x106   : > { %v1109_v41 = vadd.f32 %v1036_v36, %v823_v39  ;;  %4773 = vst [vmem:[#allocation25_spill] sm:$0xff] %v4276_v48 }
 0x109   : > { %v1318_v29 = vpop.f32.mrf.mxu3 }
 0x10a   : > { %v1394_v33 = vadd.f32 %v1318_v29, %v1107_v12  ;;  %v1607_v7 = vpop.f32.mrf.mxu0  ;;  %v1046_v57 = vpop.f32.mrf.mxu2 }
 0x10b   : > { %v753_v2 = vpop.f32.mrf.mxu1 }
 0x10c   : > { %v824_v46 = vadd.f32 %v753_v2, %v4173_v38  ;;  %v4272_v4 = vadd.f32 %v1604_v15, %v1394_v33  ;;  %v4289_v33 = vpack.c.bf16 %v621_v10, %v620_v61  ;;  %v911_v2 = vld [vmem:[%s3900_s8 + $0x15a] sm:$0xff] }
 0x10d   : > { %3399 = vmatmul.msk.bf16.gmra.mxu0 %vm390_vm1, %v4267_v27  ;;  %v622_v61 = vld [vmem:[%s3900_s8 + $0x139] sm:$0xff]  ;;  %v623_v10 = vld [vmem:[%s3900_s8 + $0x141] sm:$0xff] }
 0x10e   : > { %v1110_v24 = vadd.f32 %v1039_v35, %v824_v46  ;;  %3285 = vmatmul.msk.bf16.gmra.mxu1 %vm390_vm1, %v4267_v27  ;;  %3350 = vmatmul.msk.bf16.gmra.mxu3 %vm390_vm1, %v3910_v16 }
 0x10f   : > { %3304 = vmatmul.msk.bf16.gmra.mxu2 %vm390_vm1, %v4276_v48 }
 0x111   : > { %v1321_v36 = vpop.f32.mrf.mxu3 }
 0x112   : > { %v1395_v38 = vadd.f32 %v1321_v36, %v1108_v21  ;;  %v1609_v12 = vpop.f32.mrf.mxu0  ;;  %v1049_v28 = vpop.f32.mrf.mxu2 }
 0x113   : > { %v755_v60 = vpop.f32.mrf.mxu1 }
 0x114   : > { %v825_v15 = vadd.f32 %v755_v60, %v4191_v62  ;;  %v4285_v39 = vadd.f32 %v1607_v7, %v1395_v38  ;;  %v4298_v62 = vpack.c.bf16 %v911_v2, %v910_v19  ;;  %v912_v2 = vld [vmem:[%s3900_s8 + $0x16a] sm:$0xff] }
 0x116   : > { %v1111_v35 = vadd.f32 %v1041_v14, %v825_v15  ;;  %4774 = vst [vmem:[#allocation26_spill] sm:$0xff] %v4298_v62 }
 0x119   : > { %v1323_v29 = vpop.f32.mrf.mxu3 }
 0x11a   : > { %v1396_v16 = vadd.f32 %v1323_v29, %v1109_v41  ;;  %v1612_v55 = vpop.f32.mrf.mxu0  ;;  %v1051_v36 = vpop.f32.mrf.mxu2 }
 0x11b   : > { %v758_v46 = vpop.f32.mrf.mxu1 }
 0x11c   : > { %v826_v21 = vadd.f32 %v758_v46, %v4201_v32  ;;  %v4294_v48 = vadd.f32 %v1609_v12, %v1396_v16  ;;  %v4311_v16 = vpack.c.bf16 %v623_v10, %v622_v61  ;;  %v913_v46 = vld [vmem:[%s3900_s8 + $0x172] sm:$0xff] }
 0x11d   : > { %3400 = vmatmul.msk.bf16.gmra.mxu0 %vm390_vm1, %v4289_v33  ;;  %v624_v10 = vld [vmem:[%s3900_s8 + $0x151] sm:$0xff] }
 0x11e   : > { %v1112_v14 = vadd.f32 %v1044_v11, %v826_v21  ;;  %3286 = vmatmul.msk.bf16.gmra.mxu1 %vm390_vm1, %v4289_v33  ;;  %3351 = vmatmul.msk.bf16.gmra.mxu3 %vm390_vm1, %v3937_v30 }
 0x11f   : > { %3305 = vmatmul.msk.bf16.gmra.mxu2 %vm390_vm1, %v4298_v62 }
 0x121   : > { %v1326_v41 = vpop.f32.mrf.mxu3 }
 0x122   : > { %v1397_v32 = vadd.f32 %v1326_v41, %v1110_v24  ;;  %v1614_v7 = vpop.f32.mrf.mxu0  ;;  %v1054_v60 = vpop.f32.mrf.mxu2 }
 0x123   : > { %v760_v38 = vpop.f32.mrf.mxu1 }
 0x124   : > { %v827_v12 = vadd.f32 %v760_v38, %v4218_v44  ;;  %v4307_v15 = vadd.f32 %v1612_v55, %v1397_v32  ;;  %v929_v44 = vpack.c.bf16 %v913_v46, %v912_v2 }
 0x126   : > { %v1113_v11 = vadd.f32 %v1046_v57, %v827_v12 }
 0x129   : > { %v1328_v29 = vpop.f32.mrf.mxu3 }
 0x12a   : > { %v1398_v30 = vadd.f32 %v1328_v29, %v1111_v35  ;;  %v1617_v19 = vpop.f32.mrf.mxu0  ;;  %v1056_v41 = vpop.f32.mrf.mxu2 }
 0x12b   : > { %v763_v21 = vpop.f32.mrf.mxu1 }
 0x12c   : > { %v828_v24 = vadd.f32 %v763_v21, %v4085_v47  ;;  %v4316_v62 = vadd.f32 %v1614_v7, %v1398_v30 }
 0x12d   : > { %3401 = vmatmul.msk.bf16.gmra.mxu0 %vm390_vm1, %v4311_v16 }
 0x12e   : > { %v1114_v57 = vadd.f32 %v1049_v28, %v828_v24  ;;  %3287 = vmatmul.msk.bf16.gmra.mxu1 %vm390_vm1, %v4311_v16  ;;  %3352 = vmatmul.msk.bf16.gmra.mxu3 %vm390_vm1, %v3961_v42  ;;  %v625_v28 = vld [vmem:[%s3900_s8 + $0x159] sm:$0xff] }
 0x12f   : > { %3306 = vmatmul.msk.bf16.gmra.mxu2 %vm390_vm1, %v929_v44  ;;  %v4330_v30 = vpack.c.bf16 %v625_v28, %v624_v10 }
 0x131   : > { %v1331_v35 = vpop.f32.mrf.mxu3 }
 0x132   : > { %v1399_v47 = vadd.f32 %v1331_v35, %v1112_v14  ;;  %v1619_v55 = vpop.f32.mrf.mxu0  ;;  %v1059_v38 = vpop.f32.mrf.mxu2 }
 0x133   : > { %v765_v32 = vpop.f32.mrf.mxu1 }
 0x134   : > { %v829_v7 = vadd.f32 %v765_v32, %v4101_v51  ;;  %v4326_v12 = vadd.f32 %v1617_v19, %v1399_v47  ;;  %v627_v32 = vld [vmem:[%s3900_s8 + $0x171] sm:$0xff] }
 0x136   : > { %v1115_v61 = vadd.f32 %v1051_v36, %v829_v7 }
 0x139   : > { %v1333_v29 = vpop.f32.mrf.mxu3 }
 0x13a   : > { %v1400_v2 = vadd.f32 %v1333_v29, %v1113_v11  ;;  %v1622_v46 = vpop.f32.mrf.mxu0  ;;  %v1061_v14 = vpop.f32.mrf.mxu2 }
 0x13b   : > { %v768_v42 = vpop.f32.mrf.mxu1 }
 0x13c   : > { %v830_v21 = vadd.f32 %v768_v42, %v4115_v0  ;;  %v4333_v24 = vadd.f32 %v1619_v55, %v1400_v2 }
 0x13d   : > { %3402 = vmatmul.msk.bf16.gmra.mxu0 %vm390_vm1, %v4330_v30 }
 0x13e   : > { %v1116_v51 = vadd.f32 %v1054_v60, %v830_v21  ;;  %3288 = vmatmul.msk.bf16.gmra.mxu1 %vm390_vm1, %v4330_v30  ;;  %3353 = vmatmul.msk.bf16.gmra.mxu3 %vm390_vm1, %v3986_v56  ;;  %v626_v60 = vld [vmem:[%s3900_s8 + $0x169] sm:$0xff] }
 0x13f   : > { %3487 = vmatmul.msk.bf16.vlgmr.msra.gmra.mxu2 %vm390_vm1, %v3957_v40  ;;  %v643_v10 = vpack.c.bf16 %v627_v32, %v626_v60 }
 0x141   : > { %v1336_v36 = vpop.f32.mrf.mxu3 }
 0x142   : > { %v1401_v0 = vadd.f32 %v1336_v36, %v1114_v57  ;;  %v1624_v11 = vpop.f32.mrf.mxu0  ;;  %v1064_v35 = vpop.f32.mrf.mxu2 }
 0x143   : > { %v770_v19 = vpop.f32.mrf.mxu1 }
 0x144   : > { %v831_v44 = vadd.f32 %v770_v19, %v4133_v5  ;;  %v4344_v47 = vadd.f32 %v1622_v46, %v1401_v0  ;;  %v3337_v19 = vld [vmem:[%s3900_s8 + $0x180] sm:$0xff] }
 0x146   : > { %v1117_v55 = vadd.f32 %v1056_v41, %v831_v44  ;;  %v3338_v44 = vld [vmem:[%s3900_s8 + $0x188] sm:$0xff] }
 0x149   : > { %v1338_v7 = vpop.f32.mrf.mxu3 }
 0x14a   : > { %v1402_v28 = vadd.f32 %v1338_v7, %v1115_v61  ;;  %v1627_v29 = vpop.f32.mrf.mxu0  ;;  %v1066_v40 = vpop.f32.mrf.mxu2 }
 0x14b   : > { %v773_v56 = vpop.f32.mrf.mxu1 }
 0x14c   : > { %v832_v2 = vadd.f32 %v773_v56, %v4147_v18  ;;  %v4349_v57 = vadd.f32 %v1624_v11, %v1402_v28  ;;  %v3386_v11 = vld [vmem:[%s3900_s8 + $0x181] sm:$0xff] }
 0x14d   : > { %3403 = vmatmul.msk.bf16.gmra.mxu0 %vm390_vm1, %v643_v10 }
 0x14e   : > { %v1118_v5 = vadd.f32 %v1059_v38, %v832_v2  ;;  %3289 = vmatmul.msk.bf16.gmra.mxu1 %vm390_vm1, %v643_v10  ;;  %3354 = vmatmul.msk.bf16.gmra.mxu3 %vm390_vm1, %v4020_v9  ;;  %v3387_v38 = vld [vmem:[%s3900_s8 + $0x189] sm:$0xff]  ;;  %v4364_v10 = vpack.c.bf16 %v3338_v44, %v3337_v19 }
 0x14f   : > { %3488 = vmatmul.msk.bf16.gmra.mxu2 %vm390_vm1, %v3982_v54  ;;  %v1502_v32 = vpack.c.bf16 %v3387_v38, %v3386_v11  ;;  %v3460_v11 = vld [vmem:[%s3900_s8 + $0x78] sm:$0xff]  ;;  %v3461_v38 = vld [vmem:[%s3900_s8 + $0x80] sm:$0xff] }
 0x151   : > { %v1341_v41 = vpop.f32.mrf.mxu3 }
 0x152   : > { %v1403_v18 = vadd.f32 %v1341_v41, %v1116_v51  ;;  %v1629_v61 = vpop.f32.mrf.mxu0  ;;  %v1069_v21 = vpop.f32.mrf.mxu2 }
 0x153   : > { %v775_v46 = vpop.f32.mrf.mxu1 }
 0x154   : > { %v833_v42 = vadd.f32 %v775_v46, %v4165_v26  ;;  %v4358_v36 = vadd.f32 %v1627_v29, %v1403_v18 }
 0x156   : > { %v1119_v0 = vadd.f32 %v1061_v14, %v833_v42 }
 0x159   : > { %v1343_v60 = vpop.f32.mrf.mxu3 }
 0x15a   : > { %v1404_v9 = vadd.f32 %v1343_v60, %v1117_v55  ;;  %v1632_v7 = vpop.f32.mrf.mxu0  ;;  %v1071_v28 = vpop.f32.mrf.mxu2 }
 0x15b   : > { %v778_v54 = vpop.f32.mrf.mxu1 }
 0x15c   : > { %v834_v51 = vadd.f32 %v778_v54, %v4177_v45  ;;  %v4367_v56 = vadd.f32 %v1629_v61, %v1404_v9 }
 0x15d   : > { %3404 = vmatmul.msk.bf16.gmra.mxu0 %vm390_vm1, %v1502_v32 }
 0x15e   : > { %v1120_v26 = vadd.f32 %v1064_v35, %v834_v51  ;;  %3355 = vmatmul.msk.bf16.gmra.mxu3 %vm390_vm1, %v4364_v10  ;;  %3438 = vmatmul.msk.bf16.vlgmr.msra.gmra.mxu1 %vm390_vm1, %v3992_v59 }
 0x15f   : > { %3489 = vmatmul.msk.bf16.gmra.mxu2 %vm390_vm1, %v4018_v8  ;;  %v2063_v8 = vpack.c.bf16 %v3461_v38, %v3460_v11 }
 0x161   : > { %v1346_v14 = vpop.f32.mrf.mxu3 }
 0x162   : > { %v1405_v55 = vadd.f32 %v1346_v14, %v1118_v5  ;;  %v1634_v45 = vpop.f32.mrf.mxu0  ;;  %v1074_v41 = vpop.f32.mrf.mxu2 }
 0x163   : > { %v780_v29 = vpop.f32.mrf.mxu1 }
 0x164   : > { %v835_v2 = vadd.f32 %v780_v29, %v4193_v63  ;;  %v4377_v18 = vadd.f32 %v1632_v7, %v1405_v55  ;;  %v3462_v55 = vld [vmem:[%s3900_s8 + $0x90] sm:$0xff] }
 0x166   : > { %v1121_v35 = vadd.f32 %v1066_v40, %v835_v2 }
 0x169   : > { %v1348_v61 = vpop.f32.mrf.mxu3 }
 0x16a   : > { %v1406_v46 = vadd.f32 %v1348_v61, %v1119_v0  ;;  %v1637_v42 = vpop.f32.mrf.mxu0  ;;  %v1076_v44 = vpop.f32.mrf.mxu2 }
 0x16b   : > { %v783_v19 = vpop.f32.mrf.mxu1 }
 0x16c   : > { %v836_v59 = vadd.f32 %v783_v19, %v4103_v52  ;;  %v4382_v60 = vadd.f32 %v1634_v45, %v1406_v46 }
 0x16d   : > { %3585 = vmatmul.msk.bf16.vlgmr.msra.gmra.mxu0 %vm390_vm1, %v4026_v13 }
 0x16e   : > { %v1122_v63 = vadd.f32 %v1069_v21, %v836_v59  ;;  %3439 = vmatmul.msk.bf16.gmra.mxu1 %vm390_vm1, %v4026_v13  ;;  %3536 = vmatmul.msk.bf16.vlgmr.msra.gmra.mxu3 %vm390_vm1, %v4047_v25  ;;  %v3463_v13 = vld [vmem:[%s3900_s8 + $0x98] sm:$0xff] }
 0x16f   : > { %3490 = vmatmul.msk.bf16.gmra.mxu2 %vm390_vm1, %v2063_v8  ;;  %v3464_v8 = vld [vmem:[%s3900_s8 + $0xa8] sm:$0xff] }
 0x171   : > { %v1351_v40 = vpop.f32.mrf.mxu3 }
 0x172   : > { %v1407_v52 = vadd.f32 %v1351_v40, %v1120_v26  ;;  %v1639_v5 = vpop.f32.mrf.mxu0  ;;  %v1079_v9 = vpop.f32.mrf.mxu2  ;;  %v2064_v26 = vpack.c.bf16 %v3463_v13, %v3462_v55 }
 0x173   : > { %v785_v0 = vpop.f32.mrf.mxu1 }
 0x174   : > { %v837_v32 = vadd.f32 %v785_v0, %v4117_v1  ;;  %v4392_v7 = vadd.f32 %v1637_v42, %v1407_v52 }
 0x176   : > { %v1123_v54 = vadd.f32 %v1071_v28, %v837_v32 }
 0x179   : > { %v1353_v21 = vpop.f32.mrf.mxu3 }
 0x17a   : > { %v1408_v51 = vadd.f32 %v1353_v21, %v1121_v35  ;;  %v1642_v14 = vpop.f32.mrf.mxu0  ;;  %v1081_v29 = vpop.f32.mrf.mxu2 }
 0x17b   : > { %v788_v45 = vpop.f32.mrf.mxu1 }
 0x17c   : > { %v838_v25 = vadd.f32 %v788_v45, %v4135_v6  ;;  %v4397_v2 = vadd.f32 %v1639_v5, %v1408_v51  ;;  %v3466_v45 = vld [vmem:[%s3900_s8 + $0xc0] sm:$0xff] }
 0x17d   : > { %3586 = vmatmul.msk.bf16.gmra.mxu0 %vm390_vm1, %v4038_v22 }
 0x17e   : > { %v1124_v1 = vadd.f32 %v1074_v41, %v838_v25  ;;  %3440 = vmatmul.msk.bf16.gmra.mxu1 %vm390_vm1, %v4038_v22  ;;  %3537 = vmatmul.msk.bf16.gmra.mxu3 %vm390_vm1, %v4063_v34  ;;  %v3465_v22 = vld [vmem:[%s3900_s8 + $0xb0] sm:$0xff] }
 0x17f   : > { %3491 = vmatmul.msk.bf16.gmra.mxu2 %vm390_vm1, %v2064_v26 }
 0x181   : > { %v1356_v28 = vpop.f32.mrf.mxu3 }
 0x182   : > { %v1409_v6 = vadd.f32 %v1356_v28, %v1122_v63  ;;  %v1644_v35 = vpop.f32.mrf.mxu0  ;;  %v1084_v42 = vpop.f32.mrf.mxu2  ;;  %v2065_v63 = vpack.c.bf16 %v3465_v22, %v3464_v8 }
 0x183   : > { %v790_v61 = vpop.f32.mrf.mxu1 }
 0x184   : > { %v839_v46 = vadd.f32 %v790_v61, %v4149_v20  ;;  %v4407_v11 = vadd.f32 %v1642_v14, %v1409_v6 }
 0x186   : > { %v1125_v38 = vadd.f32 %v1076_v44, %v839_v46  ;;  %v4776_v46 = vld [vmem:[#allocation9_spill] sm:$0xff] }
 0x189   : > { %v1358_v41 = vpop.f32.mrf.mxu3 }
 0x18a   : > { %v1410_v19 = vadd.f32 %v1358_v41, %v1123_v54  ;;  %v1647_v59 = vpop.f32.mrf.mxu0  ;;  %v1086_v52 = vpop.f32.mrf.mxu2 }
 0x18b   : > { %v793_v40 = vpop.f32.mrf.mxu1 }
 0x18c   : > { %v840_v34 = vadd.f32 %v793_v40, %v4095_v49  ;;  %v4412_v5 = vadd.f32 %v1644_v35, %v1410_v19  ;;  %v3468_v40 = vld [vmem:[%s3900_s8 + $0xd8] sm:$0xff] }
 0x18d   : > { %3587 = vmatmul.msk.bf16.gmra.mxu0 %vm390_vm1, %v4053_v31 }
 0x18e   : > { %v1126_v20 = vadd.f32 %v1079_v9, %v840_v34  ;;  %3441 = vmatmul.msk.bf16.gmra.mxu1 %vm390_vm1, %v4053_v31  ;;  %3538 = vmatmul.msk.bf16.gmra.mxu3 %vm390_vm1, %v4079_v43  ;;  %v3467_v31 = vld [vmem:[%s3900_s8 + $0xc8] sm:$0xff] }
 0x18f   : > { %3492 = vmatmul.msk.bf16.gmra.mxu2 %vm390_vm1, %v2065_v63  ;;  %v4777_v63 = vld [vmem:[#allocation12_spill] sm:$0xff] }
 0x191   : > { %v1361_v44 = vpop.f32.mrf.mxu3 }
 0x192   : > { %v1411_v49 = vadd.f32 %v1361_v44, %v1124_v1  ;;  %v1649_v0 = vpop.f32.mrf.mxu0  ;;  %v1089_v21 = vpop.f32.mrf.mxu2  ;;  %v2066_v1 = vpack.c.bf16 %v3467_v31, %v3466_v45  ;;  %v4780_v45 = vld [vmem:[#allocation13_spill] sm:$0xff] }
 0x193   : > { %v795_v32 = vpop.f32.mrf.mxu1 }
 0x194   : > { %v841_v54 = vadd.f32 %v795_v32, %v4107_v58  ;;  %v4422_v51 = vadd.f32 %v1647_v59, %v1411_v49 }
 0x196   : > { %v1127_v14 = vadd.f32 %v1081_v29, %v841_v54  ;;  %v4775_v29 = vld [vmem:[#allocation7_spill] sm:$0xff] }
 0x199   : > { %v1363_v9 = vpop.f32.mrf.mxu3 }
 0x19a   : > { %v1412_v55 = vadd.f32 %v1363_v9, %v1125_v38  ;;  %v1652_v13 = vpop.f32.mrf.mxu0  ;;  %v1091_v26 = vpop.f32.mrf.mxu2 }
 0x19b   : > { %v798_v25 = vpop.f32.mrf.mxu1 }
 0x19c   : > { %v842_v43 = vadd.f32 %v798_v25, %v4127_v3  ;;  %v4427_v28 = vadd.f32 %v1649_v0, %v1412_v55 }
 0x19d   : > { %3588 = vmatmul.msk.bf16.gmra.mxu0 %vm390_vm1, %v4069_v37 }
 0x19e   : > { %v1128_v58 = vadd.f32 %v1084_v42, %v842_v43  ;;  %3442 = vmatmul.msk.bf16.gmra.mxu1 %vm390_vm1, %v4069_v37  ;;  %3539 = vmatmul.msk.bf16.gmra.mxu3 %vm390_vm1, %v4775_v29  ;;  %v3469_v37 = vld [vmem:[%s3900_s8 + $0xe0] sm:$0xff] }
 0x19f   : > { %3493 = vmatmul.msk.bf16.gmra.mxu2 %vm390_vm1, %v2066_v1  ;;  %v2067_v32 = vpack.c.bf16 %v3469_v37, %v3468_v40 }
 0x1a1   : > { %v1366_v6 = vpop.f32.mrf.mxu3 }
 0x1a2   : > { %v1413_v3 = vadd.f32 %v1366_v6, %v1126_v20  ;;  %v1654_v35 = vpop.f32.mrf.mxu0  ;;  %v1094_v41 = vpop.f32.mrf.mxu2  ;;  %v4778_v20 = vld [vmem:[#allocation6_spill] sm:$0xff] }
 0x1a3   : > { %v800_v61 = vpop.f32.mrf.mxu1 }
 0x1a4   : > { %v843_v38 = vadd.f32 %v800_v61, %v4776_v46  ;;  %v4437_v19 = vadd.f32 %v1652_v13, %v1413_v3  ;;  %v3470_v3 = vld [vmem:[%s3900_s8 + $0xf0] sm:$0xff] }
 0x1a5   : > { %v4781_v46 = vld [vmem:[#allocation16_spill] sm:$0xff] }
 0x1a6   : > { %v1129_v59 = vadd.f32 %v1086_v52, %v843_v38  ;;  %v4779_v52 = vld [vmem:[#allocation10_spill] sm:$0xff] }
 0x1a9   : > { %v1368_v42 = vpop.f32.mrf.mxu3 }
 0x1aa   : > { %v1414_v8 = vadd.f32 %v1368_v42, %v1127_v14  ;;  %v1657_v22 = vpop.f32.mrf.mxu0  ;;  %v1096_v49 = vpop.f32.mrf.mxu2 }
 0x1ab   : > { %v803_v34 = vpop.f32.mrf.mxu1 }
 0x1ac   : > { %v844_v44 = vadd.f32 %v803_v34, %v4777_v63  ;;  %v4442_v0 = vadd.f32 %v1654_v35, %v1414_v8  ;;  %v3471_v35 = vld [vmem:[%s3900_s8 + $0xf8] sm:$0xff] }
 0x1ad   : > { %3589 = vmatmul.msk.bf16.gmra.mxu0 %vm390_vm1, %v4778_v20  ;;  %v2068_v40 = vpack.c.bf16 %v3471_v35, %v3470_v3 }
 0x1ae   : > { %v1130_v54 = vadd.f32 %v1089_v21, %v844_v44  ;;  %3443 = vmatmul.msk.bf16.gmra.mxu1 %vm390_vm1, %v4778_v20  ;;  %3540 = vmatmul.msk.bf16.gmra.mxu3 %vm390_vm1, %v4779_v52  ;;  %v4784_v44 = vld [vmem:[#allocation17_spill] sm:$0xff] }
 0x1af   : > { %3494 = vmatmul.msk.bf16.gmra.mxu2 %vm390_vm1, %v2067_v32 }
 0x1b1   : > { %v1371_v14 = vpop.f32.mrf.mxu3 }
 0x1b2   : > { %v1415_v9 = vadd.f32 %v1371_v14, %v1128_v58  ;;  %v1659_v55 = vpop.f32.mrf.mxu0  ;;  %v1099_v25 = vpop.f32.mrf.mxu2  ;;  %v4782_v58 = vld [vmem:[#allocation8_spill] sm:$0xff] }
 0x1b3   : > { %v805_v13 = vpop.f32.mrf.mxu1 }
 0x1b4   : > { %v845_v31 = vadd.f32 %v805_v13, %v4780_v45  ;;  %v4452_v43 = vadd.f32 %v1657_v22, %v1415_v9  ;;  %v3472_v13 = vld [vmem:[%s3900_s8 + $0x108] sm:$0xff]  ;;  %v3473_v45 = vld [vmem:[%s3900_s8 + $0x110] sm:$0xff] }
 0x1b6   : > { %v1131_v1 = vadd.f32 %v1091_v26, %v845_v31  ;;  %v4783_v26 = vld [vmem:[#allocation14_spill] sm:$0xff] }
 0x1b9   : > { %v1373_v21 = vpop.f32.mrf.mxu3 }
 0x1ba   : > { %v1416_v29 = vadd.f32 %v1373_v21, %v1129_v59  ;;  %v1662_v6 = vpop.f32.mrf.mxu0  ;;  %v1101_v42 = vpop.f32.mrf.mxu2  ;;  %v4785_v21 = vld [vmem:[#allocation20_spill] sm:$0xff] }
 0x1bb   : > { %v808_v61 = vpop.f32.mrf.mxu1 }
 0x1bc   : > { %v846_v38 = vadd.f32 %v808_v61, %v4781_v46  ;;  %v4457_v8 = vadd.f32 %v1659_v55, %v1416_v29  ;;  %v2069_v61 = vpack.c.bf16 %v3473_v45, %v3472_v13 }
 0x1bd   : > { %3590 = vmatmul.msk.bf16.gmra.mxu0 %vm390_vm1, %v4782_v58 }
 0x1be   : > { %v1132_v37 = vadd.f32 %v1094_v41, %v846_v38  ;;  %3444 = vmatmul.msk.bf16.gmra.mxu1 %vm390_vm1, %v4782_v58  ;;  %3541 = vmatmul.msk.bf16.gmra.mxu3 %vm390_vm1, %v4783_v26 }
 0x1bf   : > { %3495 = vmatmul.msk.bf16.gmra.mxu2 %vm390_vm1, %v2068_v40  ;;  %v4788_v40 = vld [vmem:[#allocation21_spill] sm:$0xff] }
 0x1c1   : > { %v1376_v59 = vpop.f32.mrf.mxu3 }
 0x1c2   : > { %v1417_v22 = vadd.f32 %v1376_v59, %v1130_v54  ;;  %v1664_v34 = vpop.f32.mrf.mxu0  ;;  %v2170_v32 = vpop.f32.mrf.mxu2  ;;  %v4786_v54 = vld [vmem:[#allocation11_spill] sm:$0xff] }
 0x1c3   : > { %v810_v63 = vpop.f32.mrf.mxu1 }
 0x1c4   : > { %v847_v20 = vadd.f32 %v810_v63, %v4784_v44  ;;  %v4467_v52 = vadd.f32 %v1662_v6, %v1417_v22 }
 0x1c6   : > { %v1133_v14 = vadd.f32 %v1096_v49, %v847_v20  ;;  %v4787_v49 = vld [vmem:[#allocation18_spill] sm:$0xff] }
 0x1c7   : > { %v3474_v20 = vld [vmem:[%s3900_s8 + $0x120] sm:$0xff] }
 0x1c9   : > { %v1378_v41 = vpop.f32.mrf.mxu3 }
 0x1ca   : > { %v1418_v9 = vadd.f32 %v1378_v41, %v1131_v1  ;;  %v1667_v55 = vpop.f32.mrf.mxu0  ;;  %v2172_v3 = vpop.f32.mrf.mxu2  ;;  %v3475_v41 = vld [vmem:[%s3900_s8 + $0x128] sm:$0xff] }
 0x1cb   : > { %v813_v31 = vpop.f32.mrf.mxu1 }
 0x1cc   : > { %v848_v29 = vadd.f32 %v813_v31, %v4785_v21  ;;  %v4472_v35 = vadd.f32 %v1664_v34, %v1418_v9  ;;  %v2070_v21 = vpack.c.bf16 %v3475_v41, %v3474_v20 }
 0x1cd   : > { %3591 = vmatmul.msk.bf16.gmra.mxu0 %vm390_vm1, %v4786_v54 }
 0x1ce   : > { %v1134_v46 = vadd.f32 %v1099_v25, %v848_v29  ;;  %3445 = vmatmul.msk.bf16.gmra.mxu1 %vm390_vm1, %v4786_v54  ;;  %3542 = vmatmul.msk.bf16.gmra.mxu3 %vm390_vm1, %v4787_v49 }
 0x1cf   : > { %3496 = vmatmul.msk.bf16.gmra.mxu2 %vm390_vm1, %v2069_v61 }
 0x1d1   : > { %v1381_v1 = vpop.f32.mrf.mxu3 }
 0x1d2   : > { %v1419_v6 = vadd.f32 %v1381_v1, %v1132_v37  ;;  %v1669_v38 = vpop.f32.mrf.mxu0  ;;  %v2175_v59 = vpop.f32.mrf.mxu2  ;;  %v4789_v37 = vld [vmem:[#allocation15_spill] sm:$0xff] }
 0x1d3   : > { %v815_v58 = vpop.f32.mrf.mxu1 }
 0x1d4   : > { %v849_v26 = vadd.f32 %v815_v58, %v4788_v40  ;;  %v4482_v22 = vadd.f32 %v1667_v55, %v1419_v6  ;;  %v3674_v40 = vld [vmem:[%s4725_s3 + $0x38] sm:$0xff] }
 0x1d5   : > { %3090 = vmatpush.bf16.msrb.mxu1 %v3674_v40 }
 0x1d6   : > { %v1135_v34 = vadd.f32 %v1101_v42, %v849_v26  ;;  %v4790_v42 = vld [vmem:[#allocation22_spill] sm:$0xff]  ;;  %v3476_v26 = vld [vmem:[%s3900_s8 + $0x138] sm:$0xff] }
 0x1d9   : > { %v1383_v25 = vpop.f32.mrf.mxu3 }
 0x1da   : > { %v1420_v63 = vadd.f32 %v1383_v25, %v1133_v14  ;;  %v1672_v44 = vpop.f32.mrf.mxu0  ;;  %v2177_v45 = vpop.f32.mrf.mxu2  ;;  %v3477_v25 = vld [vmem:[%s3900_s8 + $0x140] sm:$0xff] }
 0x1db   : > { %v1883_v9 = vpop.f32.mrf.mxu1 }
 0x1dc   : > { %v1963_v13 = vadd.f32 %v1883_v9, %v4241_v53  ;;  %v4487_v31 = vadd.f32 %v1669_v38, %v1420_v63 }
 0x1dd   : > { %3592 = vmatmul.msk.bf16.gmra.mxu0 %vm390_vm1, %v4789_v37 }
 0x1de   : > { %v2250_v29 = vadd.f32 %v2170_v32, %v1963_v13  ;;  %3446 = vmatmul.msk.bf16.gmra.mxu1 %vm390_vm1, %v4789_v37  ;;  %3543 = vmatmul.msk.bf16.gmra.mxu3 %vm390_vm1, %v4790_v42 }
 0x1df   : > { %3497 = vmatmul.msk.bf16.gmra.mxu2 %vm390_vm1, %v2070_v21 }
 0x1e1   : > { %v1386_v14 = vpop.f32.mrf.mxu3 }
 0x1e2   : > { %v1421_v53 = vadd.f32 %v1386_v14, %v1134_v46  ;;  %v1674_v55 = vpop.f32.mrf.mxu0  ;;  %v2180_v49 = vpop.f32.mrf.mxu2 }
 0x1e3   : > { %v1885_v54 = vpop.f32.mrf.mxu1 }
 0x1e4   : > { %v1964_v61 = vadd.f32 %v1885_v54, %v4250_v50  ;;  %v4497_v1 = vadd.f32 %v1672_v44, %v1421_v53  ;;  %v4791_v50 = vld [vmem:[#allocation19_spill] sm:$0xff] }
 0x1e6   : > { %v2251_v32 = vadd.f32 %v2172_v3, %v1964_v61  ;;  %v2071_v3 = vpack.c.bf16 %v3477_v25, %v3476_v26  ;;  %v3479_v61 = vld [vmem:[%s3900_s8 + $0x158] sm:$0xff] }
 0x1e9   : > { %v1388_v6 = vpop.f32.mrf.mxu3 }
 0x1ea   : > { %v1422_v38 = vadd.f32 %v1388_v6, %v1135_v34  ;;  %v2742_v58 = vpop.f32.mrf.mxu0  ;;  %v2182_v20 = vpop.f32.mrf.mxu2 }
 0x1eb   : > { %v1888_v63 = vpop.f32.mrf.mxu1 }
 0x1ec   : > { %v1965_v46 = vadd.f32 %v1888_v63, %v4263_v23  ;;  %v4505_v41 = vadd.f32 %v1674_v55, %v1422_v38 }
 0x1ed   : > { %3593 = vmatmul.msk.bf16.gmra.mxu0 %vm390_vm1, %v4791_v50 }
 0x1ee   : > { %v2252_v44 = vadd.f32 %v2175_v59, %v1965_v46  ;;  %3447 = vmatmul.msk.bf16.gmra.mxu1 %vm390_vm1, %v4791_v50  ;;  %3544 = vmatmul.msk.bf16.gmra.mxu3 %vm390_vm1, %v4245_v17  ;;  %v4518_v59 = vld [vmem:[%s4724_s2] ss:$0 sm:$0xff]  ;;  %v3478_v17 = vld [vmem:[%s3900_s8 + $0x150] sm:$0xff] }
 0x1ef   : > { %3498 = vmatmul.msk.bf16.gmra.mxu2 %vm390_vm1, %v2071_v3 }
 0x1f1   : > { %v2456_v34 = vpop.f32.mrf.mxu3 }
 0x1f2   : > { %v2536_v23 = vadd.f32 %v2456_v34, %v2250_v29  ;;  %v2744_v9 = vpop.f32.mrf.mxu0  ;;  %v2185_v42 = vpop.f32.mrf.mxu2 }
 0x1f3   : > { %v1890_v13 = vpop.f32.mrf.mxu1 }
 0x1f4   : > { %v2822_v37 = vadd.f32 %v2742_v58, %v2536_v23  ;;  %v1966_v21 = vadd.f32 %v1890_v13, %v4272_v4  ;;  %v4792_v4 = vld [vmem:[#allocation23_spill] sm:$0xff] }
 0x1f6   : > { %v2253_v14 = vadd.f32 %v2177_v45, %v1966_v21  ;;  %v2922_v29 = vadd.f32 %v4518_v59, %v2822_v37  ;;  %v2072_v45 = vpack.c.bf16 %v3479_v61, %v3478_v17  ;;  %v3673_v61 = vld [vmem:[%s4725_s3 + $0x30] sm:$0xff] }
 0x1f7   : > { %3091 = vmatpush.bf16.msrb.mxu1 %v3673_v61 }
 0x1f9   : > { %v2458_v53 = vpop.f32.mrf.mxu3 }
 0x1fa   : > { %v2537_v55 = vadd.f32 %v2458_v53, %v2251_v32  ;;  %v2747_v54 = vpop.f32.mrf.mxu0  ;;  %v2187_v40 = vpop.f32.mrf.mxu2  ;;  %v2954_v32 = vmax.f32 %v2922_v29, 0.0 }
 0x1fb   : > { %v1893_v6 = vpop.f32.mrf.mxu1 }
 0x1fc   : > { %v2823_v38 = vadd.f32 %v2744_v9, %v2537_v55  ;;  %v1967_v58 = vadd.f32 %v1893_v6, %v4285_v39  ;;  %v3480_v6 = vld [vmem:[%s3900_s8 + $0x168] sm:$0xff] }
 0x1fd   : > { %3594 = vmatmul.msk.bf16.gmra.mxu0 %vm390_vm1, %v4792_v4 }
 0x1fe   : > { %v2923_v26 = vadd.f32 %v4518_v59, %v2823_v38  ;;  %v2254_v25 = vadd.f32 %v2180_v49, %v1967_v58  ;;  %3448 = vmatmul.msk.bf16.gmra.mxu1 %vm390_vm1, %v4792_v4  ;;  %3545 = vmatmul.msk.bf16.gmra.mxu3 %vm390_vm1, %v4267_v27  ;;  %v4793_v58 = vld [vmem:[#allocation24_spill] sm:$0xff] }
 0x1ff   : > { %3499 = vmatmul.msk.bf16.gmra.mxu2 %vm390_vm1, %v2072_v45 }
 0x200   : > { %v2955_v63 = vmax.f32 %v2923_v26, 0.0 }
 0x201   : > { %v2461_v46 = vpop.f32.mrf.mxu3 }
 0x202   : > { %v2986_v39 = vadd.f32 %v2955_v63, %v2954_v32  ;;  %v2538_v50 = vadd.f32 %v2461_v46, %v2252_v44  ;;  %v2749_v3 = vpop.f32.mrf.mxu0  ;;  %v2190_v9 = vpop.f32.mrf.mxu2  ;;  %v3481_v44 = vld [vmem:[%s3900_s8 + $0x170] sm:$0xff] }
 0x203   : > { %v1895_v34 = vpop.f32.mrf.mxu1 }
 0x204   : > { %v2824_v23 = vadd.f32 %v2747_v54, %v2538_v50  ;;  %v1968_v49 = vadd.f32 %v1895_v34, %v4294_v48 }
 0x206   : > { %v2924_v13 = vadd.f32 %v4518_v59, %v2824_v23  ;;  %v2255_v37 = vadd.f32 %v2182_v20, %v1968_v49  ;;  %v2073_v20 = vpack.c.bf16 %v3481_v44, %v3480_v6 }
 0x208   : > { %v2956_v21 = vmax.f32 %v2924_v13, 0.0 }
 0x209   : > { %v2463_v27 = vpop.f32.mrf.mxu3 }
 0x20a   : > { %v2987_v53 = vadd.f32 %v2986_v39, %v2956_v21  ;;  %v2539_v55 = vadd.f32 %v2463_v27, %v2253_v14  ;;  %v2752_v17 = vpop.f32.mrf.mxu0  ;;  %v4540_v48 = vpop.f32.mrf.mxu2 }
 0x20b   : > { %v1898_v29 = vpop.f32.mrf.mxu1 }
 0x20c   : > { %v2825_v38 = vadd.f32 %v2749_v3, %v2539_v55  ;;  %v1969_v54 = vadd.f32 %v1898_v29, %v4307_v15 }
 0x20d   : > { %3595 = vmatmul.msk.bf16.gmra.mxu0 %vm390_vm1, %v4793_v58 }
 0x20e   : > { %v2925_v14 = vadd.f32 %v4518_v59, %v2825_v38  ;;  %v2256_v4 = vadd.f32 %v2185_v42, %v1969_v54  ;;  %3449 = vmatmul.msk.bf16.gmra.mxu1 %vm390_vm1, %v4793_v58  ;;  %3546 = vmatmul.msk.bf16.gmra.mxu3 %vm390_vm1, %v4289_v33  ;;  %v3576_v54 = vld [vmem:[%s3900_s8 + $0x152] sm:$0xff]  ;;  %v3577_v58 = vld [vmem:[%s3900_s8 + $0x15a] sm:$0xff] }
 0x20f   : > { %3500 = vmatmul.msk.bf16.gmra.mxu2 %vm390_vm1, %v2073_v20 }
 0x210   : > { %v2957_v45 = vmax.f32 %v2925_v14, 0.0 }
 0x211   : > { %v2466_v26 = vpop.f32.mrf.mxu3 }
 0x212   : > { %v2988_v15 = vadd.f32 %v2987_v53, %v2957_v45  ;;  %v2540_v32 = vadd.f32 %v2466_v26, %v2254_v25  ;;  %v2754_v63 = vpop.f32.mrf.mxu0  ;;  %v2195_v3 = vpop.f32.mrf.mxu2  ;;  %v4794_v53 = vld [vmem:[#allocation25_spill] sm:$0xff] }
 0x213   : > { %v1900_v46 = vpop.f32.mrf.mxu1 }
 0x214   : > { %v2826_v39 = vadd.f32 %v2752_v17, %v2540_v32  ;;  %v1970_v50 = vadd.f32 %v1900_v46, %v4316_v62 }
 0x216   : > { %v2926_v42 = vadd.f32 %v4518_v59, %v2826_v39  ;;  %v2257_v34 = vadd.f32 %v2187_v40, %v1970_v50 }
 0x218   : > { %v2958_v23 = vmax.f32 %v2926_v42, 0.0 }
 0x219   : > { %v2468_v49 = vpop.f32.mrf.mxu3 }
 0x21a   : > { %v2989_v13 = vadd.f32 %v2988_v15, %v2958_v23  ;;  %v2541_v21 = vadd.f32 %v2468_v49, %v2255_v37  ;;  %v2757_v33 = vpop.f32.mrf.mxu0  ;;  %v2197_v25 = vpop.f32.mrf.mxu2 }
 0x21b   : > { %v1903_v27 = vpop.f32.mrf.mxu1 }
 0x21c   : > { %v2827_v55 = vadd.f32 %v2754_v63, %v2541_v21  ;;  %v1971_v61 = vadd.f32 %v1903_v27, %v4326_v12  ;;  %v3485_v63 = vld [vmem:[%s3900_s8 + $0x1a0] sm:$0xff] }
 0x21d   : > { %3596 = vmatmul.msk.bf16.gmra.mxu0 %vm390_vm1, %v4794_v53 }
 0x21e   : > { %v2927_v62 = vadd.f32 %v4518_v59, %v2827_v55  ;;  %v2258_v17 = vadd.f32 %v2190_v9, %v1971_v61  ;;  %3450 = vmatmul.msk.bf16.gmra.mxu1 %vm390_vm1, %v4794_v53  ;;  %3547 = vmatmul.msk.bf16.gmra.mxu3 %vm390_vm1, %v4311_v16  ;;  %v2644_v16 = vpack.c.bf16 %v3577_v58, %v3576_v54 }
 0x21f   : > { %3501 = vmatmul.msk.bf16.gmra.mxu2 %vm390_vm1, %v4364_v10  ;;  %v3672_v10 = vld [vmem:[%s4725_s3 + $0x28] sm:$0xff] }
 0x220   : > { %v2959_v40 = vmax.f32 %v2927_v62, 0.0  ;;  %3092 = vmatpush.bf16.msrb.mxu1 %v3672_v10 }
 0x221   : > { %v2471_v37 = vpop.f32.mrf.mxu3 }
 0x222   : > { %v2990_v12 = vadd.f32 %v2989_v13, %v2959_v40  ;;  %v2542_v6 = vadd.f32 %v2471_v37, %v2256_v4  ;;  %v2759_v44 = vpop.f32.mrf.mxu0  ;;  %v2200_v20 = vpop.f32.mrf.mxu2  ;;  %v3484_v4 = vld [vmem:[%s3900_s8 + $0x198] sm:$0xff]  ;;  %v4795_v13 = vld [vmem:[#allocation26_spill] sm:$0xff] }
 0x223   : > { %v1905_v29 = vpop.f32.mrf.mxu1  ;;  %v2075_v42 = vpack.c.bf16 %v3485_v63, %v3484_v4 }
 0x224   : > { %v2828_v38 = vadd.f32 %v2757_v33, %v2542_v6  ;;  %v3529_v6 = vld [vmem:[%s3900_s8 + $0x169] sm:$0xff] }
 0x226   : > { %v2928_v9 = vadd.f32 %v4518_v59, %v2828_v38 }
 0x228   : > { %v2960_v14 = vmax.f32 %v2928_v9, 0.0 }
 0x229   : > { %v2473_v45 = vpop.f32.mrf.mxu3 }
 0x22a   : > { %v2991_v26 = vadd.f32 %v2990_v12, %v2960_v14  ;;  %v2543_v15 = vadd.f32 %v2473_v45, %v2257_v34  ;;  %v2762_v32 = vpop.f32.mrf.mxu0  ;;  %v3434_v12 = vld [vmem:[%s3900_s8 + $0x172] sm:$0xff] }
 0x22b   : > { %v1908_v46 = vpop.f32.mrf.mxu1 }
 0x22c   : > { %v2829_v39 = vadd.f32 %v2759_v44, %v2543_v15  ;;  %v1973_v50 = vadd.f32 %v1908_v46, %v4344_v47  ;;  %v2202_v47 = vpop.f32.mrf.mxu2  ;;  %v3530_v44 = vld [vmem:[%s3900_s8 + $0x171] sm:$0xff] }
 0x22d   : > { %3597 = vmatmul.msk.bf16.gmra.mxu0 %vm390_vm1, %v2644_v16  ;;  %v2359_v16 = vpack.c.bf16 %v3530_v44, %v3529_v6 }
 0x22e   : > { %v2929_v23 = vadd.f32 %v4518_v59, %v2829_v39  ;;  %v2260_v49 = vadd.f32 %v2195_v3, %v1973_v50  ;;  %3451 = vmatmul.msk.bf16.gmra.mxu1 %vm390_vm1, %v4795_v13  ;;  %3548 = vmatmul.msk.bf16.gmra.mxu3 %vm390_vm1, %v4330_v30  ;;  %v1972_v3 = vadd.f32 %v1905_v29, %v4333_v24  ;;  %v3433_v30 = vld [vmem:[%s3900_s8 + $0x16a] sm:$0xff] }
 0x22f   : > { %3502 = vmatmul.msk.bf16.gmra.mxu2 %vm390_vm1, %v2075_v42  ;;  %v1787_v58 = vpack.c.bf16 %v3434_v12, %v3433_v30  ;;  %v3436_v13 = vld [vmem:[%s3900_s8 + $0x18a] sm:$0xff] }
 0x230   : > { %v2961_v34 = vmax.f32 %v2929_v23, 0.0  ;;  %v2259_v38 = vadd.f32 %v4540_v48, %v1972_v3 }
 0x231   : > { %v2476_v21 = vpop.f32.mrf.mxu3 }
 0x232   : > { %v2992_v33 = vadd.f32 %v2991_v26, %v2961_v34  ;;  %v2544_v27 = vadd.f32 %v2476_v21, %v2258_v17  ;;  %v2764_v55 = vpop.f32.mrf.mxu0  ;;  %v3531_v34 = vld [vmem:[%s3900_s8 + $0x181] sm:$0xff]  ;;  %v3532_v21 = vld [vmem:[%s3900_s8 + $0x189] sm:$0xff] }
 0x233   : > { %v1910_v61 = vpop.f32.mrf.mxu1 }
 0x234   : > { %v2830_v53 = vadd.f32 %v2762_v32, %v2544_v27  ;;  %v1974_v62 = vadd.f32 %v1910_v61, %v4349_v57  ;;  %v2205_v29 = vpop.f32.mrf.mxu2 }
 0x236   : > { %v2930_v40 = vadd.f32 %v4518_v59, %v2830_v53  ;;  %v2261_v37 = vadd.f32 %v2197_v25, %v1974_v62  ;;  %v3671_v62 = vld [vmem:[%s4725_s3 + $0x20] sm:$0xff] }
 0x237   : > { %3093 = vmatpush.bf16.msrb.mxu1 %v3671_v62 }
 0x238   : > { %v2962_v9 = vmax.f32 %v2930_v40, 0.0 }
 0x239   : > { %v2478_v54 = vpop.f32.mrf.mxu3 }
 0x23a   : > { %v2993_v17 = vadd.f32 %v2992_v33, %v2962_v9  ;;  %v2545_v14 = vadd.f32 %v2478_v54, %v2259_v38  ;;  %v2767_v45 = vpop.f32.mrf.mxu0 }
 0x23b   : > { %v1913_v24 = vpop.f32.mrf.mxu1 }
 0x23c   : > { %v2831_v26 = vadd.f32 %v2764_v55, %v2545_v14  ;;  %v1975_v57 = vadd.f32 %v1913_v24, %v4358_v36  ;;  %v2207_v50 = vpop.f32.mrf.mxu2  ;;  %v3583_v24 = vld [vmem:[%s3900_s8 + $0x1a2] sm:$0xff] }
 0x23d   : > { %3598 = vmatmul.msk.bf16.gmra.mxu0 %vm390_vm1, %v1787_v58 }
 0x23e   : > { %v2931_v25 = vadd.f32 %v4518_v59, %v2831_v26  ;;  %v2262_v15 = vadd.f32 %v2200_v20, %v1975_v57  ;;  %3452 = vmatmul.msk.bf16.gmra.mxu1 %vm390_vm1, %v1787_v58  ;;  %3549 = vmatmul.msk.bf16.gmra.mxu3 %vm390_vm1, %v2359_v16  ;;  %v3435_v20 = vld [vmem:[%s3900_s8 + $0x182] sm:$0xff]  ;;  %v3582_v16 = vld [vmem:[%s3900_s8 + $0x19a] sm:$0xff] }
 0x23f   : > { %v1788_v55 = vpack.c.bf16 %v3436_v13, %v3435_v20  ;;  %v3534_v26 = vld [vmem:[%s3900_s8 + $0x1a1] sm:$0xff] }
 0x240   : > { %v2963_v48 = vmax.f32 %v2931_v25, 0.0 }
 0x241   : > { %v2481_v32 = vpop.f32.mrf.mxu3 }
 0x242   : > { %v2994_v10 = vadd.f32 %v2993_v17, %v2963_v48  ;;  %v2546_v4 = vadd.f32 %v2481_v32, %v2260_v49  ;;  %v2769_v63 = vpop.f32.mrf.mxu0  ;;  %v2360_v49 = vpack.c.bf16 %v3532_v21, %v3531_v34  ;;  %v2647_v48 = vpack.c.bf16 %v3583_v24, %v3582_v16 }
 0x243   : > { %v1915_v46 = vpop.f32.mrf.mxu1 }
 0x244   : > { %v2832_v36 = vadd.f32 %v2767_v45, %v2546_v4  ;;  %v1976_v39 = vadd.f32 %v1915_v46, %v4367_v56 }
 0x246   : > { %v2932_v42 = vadd.f32 %v4518_v59, %v2832_v36  ;;  %v2263_v23 = vadd.f32 %v2202_v47, %v1976_v39 }
 0x248   : > { %v2964_v33 = vmax.f32 %v2932_v42, 0.0 }
 0x249   : > { %v2483_v27 = vpop.f32.mrf.mxu3 }
 0x24a   : > { %v2995_v61 = vadd.f32 %v2994_v10, %v2964_v33  ;;  %v2547_v3 = vadd.f32 %v2483_v27, %v2261_v37  ;;  %v2772_v53 = vpop.f32.mrf.mxu0  ;;  %v2210_v37 = vpop.f32.mrf.mxu2 }
 0x24b   : > { %v1918_v56 = vpop.f32.mrf.mxu1 }
 0x24c   : > { %v2833_v40 = vadd.f32 %v2769_v63, %v2547_v3  ;;  %v1977_v30 = vadd.f32 %v1918_v56, %v4377_v18 }
 0x24d   : > { %3599 = vmatmul.msk.bf16.gmra.mxu0 %vm390_vm1, %v1788_v55 }
 0x24e   : > { %v2933_v47 = vadd.f32 %v4518_v59, %v2833_v40  ;;  %v2264_v12 = vadd.f32 %v2205_v29, %v1977_v30  ;;  %3453 = vmatmul.msk.bf16.gmra.mxu1 %vm390_vm1, %v1788_v55  ;;  %3550 = vmatmul.msk.bf16.gmra.mxu3 %vm390_vm1, %v2360_v49  ;;  %v3533_v29 = vld [vmem:[%s3900_s8 + $0x199] sm:$0xff] }
 0x24f   : > { %v3670_v40 = vld [vmem:[%s4725_s3 + $0x18] sm:$0xff] }
 0x250   : > { %v2965_v6 = vmax.f32 %v2933_v47, 0.0  ;;  %v3682_v30 = vld [vmem:[%s4727_s5 + $0x38] sm:$0xff]  ;;  %3094 = vmatpush.bf16.msrb.mxu1 %v3670_v40 }
 0x251   : > { %v2486_v44 = vpop.f32.mrf.mxu3  ;;  %3170 = vmatpush.bf16.msrb.mxu2 %v3682_v30 }
 0x252   : > { %v2996_v38 = vadd.f32 %v2995_v61, %v2965_v6  ;;  %v2548_v9 = vadd.f32 %v2486_v44, %v2262_v15  ;;  %v2774_v18 = vpop.f32.mrf.mxu0  ;;  %v2212_v32 = vpop.f32.mrf.mxu2  ;;  %v2361_v15 = vpack.c.bf16 %v3534_v26, %v3533_v29 }
 0x253   : > { %v1920_v54 = vpop.f32.mrf.mxu1 }
 0x254   : > { %v2834_v58 = vadd.f32 %v2772_v53, %v2548_v9  ;;  %v1978_v17 = vadd.f32 %v1920_v54, %v4382_v60 }
 0x256   : > { %v2934_v14 = vadd.f32 %v4518_v59, %v2834_v58  ;;  %v2265_v45 = vadd.f32 %v2207_v50, %v1978_v17 }
 0x258   : > { %v2966_v57 = vmax.f32 %v2934_v14, 0.0 }
 0x259   : > { %v2488_v25 = vpop.f32.mrf.mxu3 }
 0x25a   : > { %v2997_v10 = vadd.f32 %v2996_v38, %v2966_v57  ;;  %v2549_v4 = vadd.f32 %v2488_v25, %v2263_v23  ;;  %v2777_v63 = vpop.f32.mrf.mxu0  ;;  %v2215_v23 = vpop.f32.mrf.mxu2 }
 0x25b   : > { %v1923_v46 = vpop.f32.mrf.mxu1 }
 0x25c   : > { %v2835_v36 = vadd.f32 %v2774_v18, %v2549_v4  ;;  %v1979_v39 = vadd.f32 %v1923_v46, %v4392_v7 }
 0x25d   : > { %3600 = vmatmul.msk.bf16.gmra.mxu0 %vm390_vm1, %v2647_v48 }
 0x25e   : > { %v2935_v60 = vadd.f32 %v4518_v59, %v2835_v36  ;;  %v2266_v50 = vadd.f32 %v2210_v37, %v1979_v39  ;;  %3551 = vmatmul.msk.bf16.gmra.mxu3 %vm390_vm1, %v2361_v15 }
 0x260   : > { %v2967_v42 = vmax.f32 %v2935_v60, 0.0 }
 0x261   : > { %v2491_v20 = vpop.f32.mrf.mxu3 }
 0x262   : > { %v2998_v13 = vadd.f32 %v2997_v10, %v2967_v42  ;;  %v2550_v34 = vadd.f32 %v2491_v20, %v2264_v12  ;;  %v2779_v21 = vpop.f32.mrf.mxu0  ;;  %v2217_v37 = vpop.f32.mrf.mxu2 }
 0x263   : > { %v1925_v33 = vpop.f32.mrf.mxu1 }
 0x264   : > { %v2836_v27 = vadd.f32 %v2777_v63, %v2550_v34  ;;  %v1980_v55 = vadd.f32 %v1925_v33, %v4397_v2 }
 0x266   : > { %v2936_v61 = vadd.f32 %v4518_v59, %v2836_v27  ;;  %v2267_v7 = vadd.f32 %v2212_v32, %v1980_v55  ;;  %v3681_v55 = vld [vmem:[%s4727_s5 + $0x30] sm:$0xff] }
 0x267   : > { %3171 = vmatpush.bf16.msrb.mxu2 %v3681_v55 }
 0x268   : > { %v2968_v3 = vmax.f32 %v2936_v61, 0.0 }
 0x269   : > { %v2493_v53 = vpop.f32.mrf.mxu3 }
 0x26a   : > { %v2999_v49 = vadd.f32 %v2998_v13, %v2968_v3  ;;  %v2551_v62 = vadd.f32 %v2493_v53, %v2265_v45  ;;  %v2782_v56 = vpop.f32.mrf.mxu0  ;;  %v2220_v29 = vpop.f32.mrf.mxu2 }
 0x26b   : > { %v1928_v47 = vpop.f32.mrf.mxu1 }
 0x26c   : > { %v2837_v12 = vadd.f32 %v2779_v21, %v2551_v62  ;;  %v1981_v2 = vadd.f32 %v1928_v47, %v4407_v11 }
 0x26e   : > { %v2937_v6 = vadd.f32 %v4518_v59, %v2837_v12  ;;  %v2268_v44 = vadd.f32 %v2215_v23, %v1981_v2 }
 0x270   : > { %v2969_v38 = vmax.f32 %v2937_v6, 0.0 }
 0x271   : > { %v2496_v9 = vpop.f32.mrf.mxu3 }
 0x272   : > { %v3000_v18 = vadd.f32 %v2999_v49, %v2969_v38  ;;  %v2552_v54 = vadd.f32 %v2496_v9, %v2266_v50  ;;  %v2784_v58 = vpop.f32.mrf.mxu0  ;;  %v2222_v39 = vpop.f32.mrf.mxu2 }
 0x273   : > { %v1930_v17 = vpop.f32.mrf.mxu1 }
 0x274   : > { %v2838_v14 = vadd.f32 %v2782_v56, %v2552_v54  ;;  %v1982_v45 = vadd.f32 %v1930_v17, %v4412_v5 }
 0x276   : > { %v2938_v16 = vadd.f32 %v4518_v59, %v2838_v14  ;;  %v2269_v24 = vadd.f32 %v2217_v37, %v1982_v45 }
 0x278   : > { %v2970_v11 = vmax.f32 %v2938_v16, 0.0 }
 0x279   : > { %v2498_v26 = vpop.f32.mrf.mxu3 }
 0x27a   : > { %v3001_v57 = vadd.f32 %v3000_v18, %v2970_v11  ;;  %v2553_v25 = vadd.f32 %v2498_v26, %v2267_v7  ;;  %v2787_v48 = vpop.f32.mrf.mxu0  ;;  %v2225_v7 = vpop.f32.mrf.mxu2 }
 0x27b   : > { %v1933_v32 = vpop.f32.mrf.mxu1 }
 0x27c   : > { %v2839_v10 = vadd.f32 %v2784_v58, %v2553_v25  ;;  %v1983_v4 = vadd.f32 %v1933_v32, %v4422_v51  ;;  %v3669_v51 = vld [vmem:[%s4725_s3 + $0x10] sm:$0xff] }
 0x27d   : > { %3095 = vmatpush.bf16.msrb.mxu1 %v3669_v51 }
 0x27e   : > { %v2939_v63 = vadd.f32 %v4518_v59, %v2839_v10  ;;  %v2270_v15 = vadd.f32 %v2220_v29, %v1983_v4 }
 0x280   : > { %v2971_v46 = vmax.f32 %v2939_v63, 0.0 }
 0x281   : > { %v2501_v36 = vpop.f32.mrf.mxu3 }
 0x282   : > { %v3002_v5 = vadd.f32 %v3001_v57, %v2971_v46  ;;  %v2554_v60 = vadd.f32 %v2501_v36, %v2268_v44  ;;  %v2789_v50 = vpop.f32.mrf.mxu0  ;;  %v2227_v37 = vpop.f32.mrf.mxu2 }
 0x283   : > { %v1935_v42 = vpop.f32.mrf.mxu1 }
 0x284   : > { %v2840_v20 = vadd.f32 %v2787_v48, %v2554_v60  ;;  %v1984_v12 = vadd.f32 %v1935_v42, %v4427_v28  ;;  %v3668_v60 = vld [vmem:[%s4725_s3 + $0x8] sm:$0xff] }
 0x285   : > { %3096 = vmatpush.bf16.msrb.mxu1 %v3668_v60 }
 0x286   : > { %v2940_v13 = vadd.f32 %v4518_v59, %v2840_v20  ;;  %v2271_v44 = vadd.f32 %v2222_v39, %v1984_v12 }
 0x288   : > { %v2972_v34 = vmax.f32 %v2940_v13, 0.0 }
 0x289   : > { %v2503_v21 = vpop.f32.mrf.mxu3 }
 0x28a   : > { %v3003_v33 = vadd.f32 %v3002_v5, %v2972_v34  ;;  %v2555_v23 = vadd.f32 %v2503_v21, %v2269_v24  ;;  %v2792_v27 = vpop.f32.mrf.mxu0  ;;  %v2230_v24 = vpop.f32.mrf.mxu2 }
 0x28b   : > { %v1938_v61 = vpop.f32.mrf.mxu1 }
 0x28c   : > { %v2841_v3 = vadd.f32 %v2789_v50, %v2555_v23  ;;  %v1985_v14 = vadd.f32 %v1938_v61, %v4437_v19  ;;  %v3680_v50 = vld [vmem:[%s4727_s5 + $0x28] sm:$0xff] }
 0x28d   : > { %3172 = vmatpush.bf16.msrb.mxu2 %v3680_v50 }
 0x28e   : > { %v2941_v53 = vadd.f32 %v4518_v59, %v2841_v3  ;;  %v2272_v29 = vadd.f32 %v2225_v7, %v1985_v14 }
 0x290   : > { %v2973_v49 = vmax.f32 %v2941_v53, 0.0 }
 0x291   : > { %v2506_v62 = vpop.f32.mrf.mxu3 }
 0x292   : > { %v3004_v56 = vadd.f32 %v3003_v33, %v2973_v49  ;;  %v2556_v40 = vadd.f32 %v2506_v62, %v2270_v15  ;;  %v2794_v30 = vpop.f32.mrf.mxu0  ;;  %v2232_v46 = vpop.f32.mrf.mxu2 }
 0x293   : > { %v1940_v47 = vpop.f32.mrf.mxu1 }
 0x294   : > { %v2842_v2 = vadd.f32 %v2792_v27, %v2556_v40  ;;  %v1986_v48 = vadd.f32 %v1940_v47, %v4442_v0 }
 0x296   : > { %v2942_v6 = vadd.f32 %v4518_v59, %v2842_v2  ;;  %v2273_v63 = vadd.f32 %v2227_v37, %v1986_v48 }
 0x298   : > { %v2974_v38 = vmax.f32 %v2942_v6, 0.0 }
 0x299   : > { %v2508_v9 = vpop.f32.mrf.mxu3 }
 0x29a   : > { %v3005_v18 = vadd.f32 %v3004_v56, %v2974_v38  ;;  %v2557_v54 = vadd.f32 %v2508_v9, %v2271_v44  ;;  %v2797_v58 = vpop.f32.mrf.mxu0  ;;  %v2235_v55 = vpop.f32.mrf.mxu2 }
 0x29b   : > { %v1943_v17 = vpop.f32.mrf.mxu1 }
 0x29c   : > { %v2843_v45 = vadd.f32 %v2794_v30, %v2557_v54  ;;  %v1987_v0 = vadd.f32 %v1943_v17, %v4452_v43 }
 0x29e   : > { %v2943_v16 = vadd.f32 %v4518_v59, %v2843_v45  ;;  %v2274_v34 = vadd.f32 %v2230_v24, %v1987_v0 }
 0x2a0   : > { %v2975_v11 = vmax.f32 %v2943_v16, 0.0 }
 0x2a1   : > { %v2511_v28 = vpop.f32.mrf.mxu3 }
 0x2a2   : > { %v3006_v26 = vadd.f32 %v3005_v18, %v2975_v11  ;;  %v2558_v57 = vadd.f32 %v2511_v28, %v2272_v29  ;;  %v2799_v25 = vpop.f32.mrf.mxu0  ;;  %v2237_v2 = vpop.f32.mrf.mxu2  ;;  %v3667_v28 = vld [vmem:[%s4725_s3] sm:$0xff] }
 0x2a3   : > { %v1945_v10 = vpop.f32.mrf.mxu1  ;;  %3097 = vmatpush.bf16.msrb.mxu1 %v3667_v28 }
 0x2a4   : > { %v2844_v32 = vadd.f32 %v2797_v58, %v2558_v57  ;;  %v1988_v61 = vadd.f32 %v1945_v10, %v4457_v8 }
 0x2a6   : > { %v2944_v4 = vadd.f32 %v4518_v59, %v2844_v32  ;;  %v2275_v53 = vadd.f32 %v2232_v46, %v1988_v61 }
 0x2a8   : > { %v2976_v15 = vmax.f32 %v2944_v4, 0.0 }
 0x2a9   : > { %v2513_v19 = vpop.f32.mrf.mxu3 }
 0x2aa   : > { %v3007_v36 = vadd.f32 %v3006_v26, %v2976_v15  ;;  %v2559_v39 = vadd.f32 %v2513_v19, %v2273_v63  ;;  %v2802_v5 = vpop.f32.mrf.mxu0  ;;  %v2240_v45 = vpop.f32.mrf.mxu2  ;;  %v3679_v26 = vld [vmem:[%s4727_s5 + $0x20] sm:$0xff] }
 0x2ab   : > { %v1948_v13 = vpop.f32.mrf.mxu1  ;;  %3173 = vmatpush.bf16.msrb.mxu2 %v3679_v26 }
 0x2ac   : > { %v2845_v42 = vadd.f32 %v2799_v25, %v2559_v39  ;;  %v1989_v47 = vadd.f32 %v1948_v13, %v4467_v52 }
 0x2ae   : > { %v2945_v20 = vadd.f32 %v4518_v59, %v2845_v42  ;;  %v2276_v6 = vadd.f32 %v2235_v55, %v1989_v47 }
 0x2b0   : > { %v2977_v21 = vmax.f32 %v2945_v20, 0.0 }
 0x2b1   : > { %v2516_v33 = vpop.f32.mrf.mxu3 }
 0x2b2   : > { %v3008_v23 = vadd.f32 %v3007_v36, %v2977_v21  ;;  %v2560_v27 = vadd.f32 %v2516_v33, %v2274_v34  ;;  %v2804_v51 = vpop.f32.mrf.mxu0  ;;  %v2242_v63 = vpop.f32.mrf.mxu2 }
 0x2b3   : > { %v1950_v49 = vpop.f32.mrf.mxu1 }
 0x2b4   : > { %v2846_v7 = vadd.f32 %v2802_v5, %v2560_v27  ;;  %v1990_v58 = vadd.f32 %v1950_v49, %v4472_v35  ;;  %v3678_v49 = vld [vmem:[%s4727_s5 + $0x18] sm:$0xff] }
 0x2b5   : > { %3174 = vmatpush.bf16.msrb.mxu2 %v3678_v49 }
 0x2b6   : > { %v2946_v3 = vadd.f32 %v4518_v59, %v2846_v7  ;;  %v2277_v16 = vadd.f32 %v2237_v2, %v1990_v58 }
 0x2b8   : > { %v2978_v43 = vmax.f32 %v2946_v3, 0.0 }
 0x2b9   : > { %v2518_v62 = vpop.f32.mrf.mxu3 }
 0x2ba   : > { %v3009_v56 = vadd.f32 %v3008_v23, %v2978_v43  ;;  %v2561_v40 = vadd.f32 %v2518_v62, %v2275_v53  ;;  %v2807_v30 = vpop.f32.mrf.mxu0  ;;  %v2245_v34 = vpop.f32.mrf.mxu2 }
 0x2bb   : > { %v1953_v9 = vpop.f32.mrf.mxu1 }
 0x2bc   : > { %v2847_v12 = vadd.f32 %v2804_v51, %v2561_v40  ;;  %v1991_v57 = vadd.f32 %v1953_v9, %v4482_v22 }
 0x2be   : > { %v2947_v37 = vadd.f32 %v4518_v59, %v2847_v12  ;;  %v2278_v10 = vadd.f32 %v2240_v45, %v1991_v57  ;;  %v3121_v57 = vld [vmem:[%s4728_s6] sm:$0x1] }
 0x2c0   : > { %v2979_v44 = vmax.f32 %v2947_v37, 0.0 }
 0x2c1   : > { %v2521_v38 = vpop.f32.mrf.mxu3 }
 0x2c2   : > { %v3010_v8 = vadd.f32 %v3009_v56, %v2979_v44  ;;  %v2562_v18 = vadd.f32 %v2521_v38, %v2276_v6  ;;  %v2809_v54 = vpop.f32.mrf.mxu0  ;;  %v2247_v62 = vpop.f32.mrf.mxu2  ;;  %v3677_v56 = vld [vmem:[%s4727_s5 + $0x10] sm:$0xff]  ;;  %v3675_v38 = vld [vmem:[%s4727_s5] sm:$0xff] }
 0x2c3   : > { %v1955_v35 = vpop.f32.mrf.mxu1  ;;  %3175 = vmatpush.bf16.msrb.mxu2 %v3677_v56 }
 0x2c4   : > { %v2848_v17 = vadd.f32 %v2807_v30, %v2562_v18  ;;  %v1992_v36 = vadd.f32 %v1955_v35, %v4487_v31 }
 0x2c6   : > { %v2948_v14 = vadd.f32 %v4518_v59, %v2848_v17  ;;  %v2279_v50 = vadd.f32 %v2242_v63, %v1992_v36 }
 0x2c8   : > { %v2980_v24 = vmax.f32 %v2948_v14, 0.0 }
 0x2c9   : > { %v2523_v52 = vpop.f32.mrf.mxu3 }
 0x2ca   : > { %v3011_v29 = vadd.f32 %v3010_v8, %v2980_v24  ;;  %v2563_v11 = vadd.f32 %v2523_v52, %v2277_v16  ;;  %v2812_v48 = vpop.f32.mrf.mxu0 }
 0x2cb   : > { %v1958_v5 = vpop.f32.mrf.mxu1 }
 0x2cc   : > { %v2849_v25 = vadd.f32 %v2809_v54, %v2563_v11  ;;  %v1993_v21 = vadd.f32 %v1958_v5, %v4497_v1 }
 0x2ce   : > { %v2949_v32 = vadd.f32 %v4518_v59, %v2849_v25  ;;  %v2280_v27 = vadd.f32 %v2245_v34, %v1993_v21 }
 0x2d0   : > { %v2981_v4 = vmax.f32 %v2949_v32, 0.0 }
 0x2d1   : > { %v2526_v15 = vpop.f32.mrf.mxu3 }
 0x2d2   : > { %v3012_v46 = vadd.f32 %v3011_v29, %v2981_v4  ;;  %v2564_v19 = vadd.f32 %v2526_v15, %v2278_v10  ;;  %v2814_v22 = vpop.f32.mrf.mxu0 }
 0x2d3   : > { %v1960_v51 = vpop.f32.mrf.mxu1 }
 0x2d4   : > { %v2850_v39 = vadd.f32 %v2812_v48, %v2564_v19  ;;  %v1994_v53 = vadd.f32 %v1960_v51, %v4505_v41  ;;  %v3676_v41 = vld [vmem:[%s4727_s5 + $0x8] sm:$0xff] }
 0x2d5   : > { %3176 = vmatpush.bf16.msrb.mxu2 %v3676_v41 }
 0x2d6   : > { %v2950_v60 = vadd.f32 %v4518_v59, %v2850_v39  ;;  %v2281_v40 = vadd.f32 %v2247_v62, %v1994_v53 }
 0x2d8   : > { %v2982_v0 = vmax.f32 %v2950_v60, 0.0 }
 0x2d9   : > { %v2528_v42 = vpop.f32.mrf.mxu3  ;;  %3177 = vmatpush.bf16.msrb.mxu2 %v3675_v38 }
 0x2da   : > { %v3013_v20 = vadd.f32 %v3012_v46, %v2982_v0  ;;  %v2565_v13 = vadd.f32 %v2528_v42, %v2279_v50  ;;  %v2817_v31 = vpop.f32.mrf.mxu0 }
 0x2dc   : > { %v2851_v33 = vadd.f32 %v2814_v22, %v2565_v13 }
 0x2de   : > { %v2951_v23 = vadd.f32 %v4518_v59, %v2851_v33 }
 0x2e0   : > { %v2983_v55 = vmax.f32 %v2951_v23, 0.0 }
 0x2e1   : > { %v2531_v61 = vpop.f32.mrf.mxu3 }
 0x2e2   : > { %v3014_v7 = vadd.f32 %v3013_v20, %v2983_v55  ;;  %v2566_v3 = vadd.f32 %v2531_v61, %v2280_v27  ;;  %v2819_v37 = vpop.f32.mrf.mxu0 }
 0x2e4   : > { %v2852_v43 = vadd.f32 %v2817_v31, %v2566_v3 }
 0x2e6   : > { %v2952_v1 = vadd.f32 %v4518_v59, %v2852_v43 }
 0x2e8   : > { %v2984_v30 = vmax.f32 %v2952_v1, 0.0 }
 0x2e9   : > { %v2533_v47 = vpop.f32.mrf.mxu3 }
 0x2ea   : > { %v3015_v12 = vadd.f32 %v3014_v7, %v2984_v30  ;;  %v2567_v2 = vadd.f32 %v2533_v47, %v2281_v40 }
 0x2ec   : > { %v2853_v6 = vadd.f32 %v2819_v37, %v2567_v2 }
 0x2ee   : > { %v2953_v44 = vadd.f32 %v4518_v59, %v2853_v6  ;;  %v3041_v59 = vld [vmem:[%s4726_s4] sm:$0x1] }
 0x2f0   : > { %v2985_v8 = vmax.f32 %v2953_v44, 0.0 }
 0x2f2   : > { %v3016_v9 = vadd.f32 %v3015_v12, %v2985_v8 }
 0x2f4   : > { %v3017_v18 = vrot.slane %v3016_v9, 4 }
 0x2f6   : > { %v3018_v54 = vadd.f32 %v3017_v18, %v3016_v9 }
 0x2f8   : > { %v3019_v58 = vrot.slane %v3018_v54, 2 }
 0x2fa   : > { %v3020_v17 = vadd.f32 %v3019_v58, %v3018_v54 }
 0x2fc   : > { %v3021_v14 = vrot.slane %v3020_v17, 1 }
 0x2fe   : > { %v3022_v45 = vadd.f32 %v3021_v14, %v3020_v17 }
 0x300   : > { %v3023_v16 = vmul.f32 0.00390625, %v3022_v45 }
 0x302   : > { %v3024_v24 = vpack.c.bf16 %v3023_v16, %v3023_v16 }
 0x304   : > { %3098 = vmatmul.bf16.vlgmr.msrb.gmra.mxu1 %v3024_v24 }
 0x381   : > { %v3099_v52 = vpop.f32.mrf.mxu1 }
 0x382   : > { %v3100_v29 = vadd.f32 %v3099_v52, %v3041_v59 }
 0x384   : > { %v3103_v11 = vmax.f32 %v3100_v29, 0.0 }
 0x386   : > { %v3104_v28 = vpack.c.bf16 %v3103_v11, %v3103_v11 }
 0x388   : > { %3178 = vmatmul.bf16.vlgmr.msrb.gmra.mxu2 %v3104_v28 }
 0x389   : > { %v3101_v26 = vpop.f32.mrf.mxu1 }
 0x40b   : > { %v3179_v35 = vpop.f32.mrf.mxu2 }
 0x40c   : > { %v3180_v25 = vadd.f32 %v3179_v35, %v3121_v57 }
 0x40e   : > { %3183 = vst [vmem:[%s270_s22] sm:$0x1] %v3180_v25 }
 0x40f   : > { %3754 = shalt.err (!%p3751_p3)
}
 0x410   : > { %3687 = dma.vmem_to_hbm [thread:$0]  (%p3869_p5), %s3196_s23, 16, %s3198_s29, %s3185_s9  }
 0x413   : > { %v3181_v48 = vpop.f32.mrf.mxu2 }
 0x414 PF: > { %p3693_p4 = scmp.ge.s32.totalorder %s3789_s27, 2  ;;  %s3209_s17 = sand.u32 1, %s3777_s24  }
 0x415   : > { %s3210_s19 = scalar_lea.sflag [#allocation4], %s3209_s17 }
 0x416   : > { %p3690_p7 = pnand %p3693_p4, %p3873_p6 }
 0x418   : > { %p3691_p8 = pneg %p3690_p7 }
 0x41a   : > { %3772 = dma.done.wait (%p3691_p8), %s3210_s19, 16  }
 0x41b   : > { %3774 = vsyncadd (%p3691_p8), %s3210_s19, 4294967280  ;;  %p17_p9 = scmp.ge.s32.totalorder %s3856_s30, 4   ;;  %s4796_s24 = smov %s3781_s25 }
 0x41c   : > { %s4797_s25 = smov %s3785_s26  ;;  %s4798_s26 = smov %s3867_s10 }
 0x41d   : > { %s4799_s27 = smov %s3856_s30  ;;  %19 = sbr.rel (!%p17_p9) target bundleno = 3 (0x3), region = 93 }
 0x422   :  { %3215 = vsyncpa [#allocation4], 1 }
 0x423   :  { %3217 = vsyncpa [#allocation4 + $0x1], 1 }

</bundles_post_ra>
